<compile_context>
chip_gen: v5e
topology: v5e:2x2
jax: 0.10.0
libtpu: 0.0.40
codegen_flags: <defaults>
</compile_context>

<pallas_src>
import jax
import jax.numpy as jnp
from jax.experimental import pallas as pl
from jax.experimental.pallas import tpu as pltpu


def _cdiv(a, b):
    return (a + b - 1) // b


def _round_up(x, m):
    return ((x + m - 1) // m) * m


def pcnet_kernel(z_ref, w0_ref, b0_ref, w1_ref, b1_ref, o_ref):
    # fc0: (tb, dim_z) @ (dim_z, N) -> f32 accumulator on the MXU.
    # Cast activations to the weight dtype (no-op for f32 weights; enables the
    # bf16 MXU rate when weights are stored in bf16).
    z = z_ref[...].astype(w0_ref.dtype)
    h = jnp.dot(z, w0_ref[...], preferred_element_type=jnp.float32)
    h = h + b0_ref[...]                      # f32 bias add (VPU)
    # Exact sigmoid: the kernel is not EUP-bound, so the previous approximate
    # reciprocal bought no performance -- keep full f32 accuracy instead.
    h = 1.0 / (1.0 + jnp.exp(-h))
    # fc1: (tb, N) @ (N, N) -> f32 accumulator.
    out = jnp.dot(h.astype(w1_ref.dtype), w1_ref[...],
                  preferred_element_type=jnp.float32)
    out = out + b1_ref[...]
    o_ref[...] = out.astype(o_ref.dtype)


def _choose_batch_tiling(batch, *, target_block=1024, single_tile_max=2048):
    """Pick (num_steps, block_b, padded_batch).

    - batch <= single_tile_max: a single grid step (per-step overhead dominates
      at this problem size, so fewer/bigger tiles win on all generations).
    - larger batches: ~target_block-row tiles, step count rounded up to an even
      number so both v7x TensorCores get work under dimension_semantics
      ("parallel",); negligible extra cost on single-TC v5e/v6e.
    - block_b is derived from the step count so per-step padding is <= 7 rows
      (sublane rounding only) and usually zero.
    """
    batch = max(int(batch), 1)
    if batch <= single_tile_max:
        num_steps = 1
    else:
        num_steps = _cdiv(batch, target_block)
        num_steps += num_steps % 2        # even step count -> both TCs on v7x
    block_b = _round_up(_cdiv(batch, num_steps), 8)
    padded = num_steps * block_b
    return num_steps, block_b, padded


def pcnet_forward(z, w0_t, b0, w1_t, b1, *, out_dtype=jnp.float32,
                  target_block=1024):
    """PcNet forward: sigmoid(z @ w0_t + b0) @ w1_t + b1.

    z: (B, dim_z); w0_t: (dim_z, N); b0: (1, N) f32; w1_t: (N, N); b1: (1, N) f32.
    Weights are pre-transposed to (in_features, out_features), f32 or bf16.
    `out_dtype=jnp.bfloat16` halves output write-back bytes for consumers that
    tolerate it (biggest relative win on v5e's HBM bandwidth).
    """
    batch, dim_z = z.shape
    n = w0_t.shape[1]

    num_steps, block_b, padded = _choose_batch_tiling(
        batch, target_block=target_block)
    if padded != batch:
        z = jnp.pad(z, ((0, padded - batch), (0, 0)))

    out = pl.pallas_call(
        pcnet_kernel,
        out_shape=jax.ShapeDtypeStruct((padded, n), out_dtype),
        grid=(num_steps,),
        in_specs=[
            # z: one batch tile per grid step.
            pl.BlockSpec((block_b, dim_z), lambda i: (i, 0)),
            # Parameters: constant index_map -> resident in VMEM across steps.
            pl.BlockSpec((dim_z, n), lambda i: (0, 0)),
            pl.BlockSpec((1, n), lambda i: (0, 0)),
            pl.BlockSpec((n, n), lambda i: (0, 0)),
            pl.BlockSpec((1, n), lambda i: (0, 0)),
        ],
        out_specs=pl.BlockSpec((block_b, n), lambda i: (i, 0)),
        compiler_params=pltpu.CompilerParams(
            dimension_semantics=("parallel",)),
    )(z, w0_t, b0, w1_t, b1)

    return out[:batch] if padded != batch else out


def pcnet_reference(z, w0_t, b0, w1_t, b1):
    zf = z.astype(jnp.float32)
    h = 1.0 / (1.0 + jnp.exp(-(zf @ w0_t.astype(jnp.float32) + b0)))
    return h @ w1_t.astype(jnp.float32) + b1


if __name__ == "__main__":
    dim_z = 16
    rom_n_cells = 128
    batch = 512            # single-tile path: exactly one grid step

    key = jax.random.PRNGKey(0)
    kz, kw0, kb0, kw1, kb1 = jax.random.split(key, 5)

    # PyTorch-Linear-like uniform init; weights stored transposed (in, out).
    bound0 = 1.0 / jnp.sqrt(dim_z)
    bound1 = 1.0 / jnp.sqrt(rom_n_cells)
    w0_t = jax.random.uniform(kw0, (dim_z, rom_n_cells), jnp.float32,
                              -bound0, bound0)
    b0 = jax.random.uniform(kb0, (1, rom_n_cells), jnp.float32, -bound0, bound0)
    w1_t = jax.random.uniform(kw1, (rom_n_cells, rom_n_cells), jnp.float32,
                              -bound1, bound1)
    b1 = jax.random.uniform(kb1, (1, rom_n_cells), jnp.float32, -bound1, bound1)

    z = jax.random.normal(kz, (batch, dim_z), jnp.float32)
    ref = pcnet_reference(z, w0_t, b0, w1_t, b1)

    # --- f32 weights, exact sigmoid, single grid step ---
    # Remaining tolerance only covers MXU-vs-XLA f32 matmul pass decomposition;
    # the sigmoid itself is now exact.
    out = jax.block_until_ready(pcnet_forward(z, w0_t, b0, w1_t, b1))
    assert out.shape == (batch, rom_n_cells)
    assert jnp.allclose(out, ref, atol=5e-3, rtol=5e-3), "f32 mismatch vs reference"

    # --- bf16 weights: halves resident-weight bytes, bf16 MXU rate ---
    w0_bf, w1_bf = w0_t.astype(jnp.bfloat16), w1_t.astype(jnp.bfloat16)
    out_bf = jax.block_until_ready(pcnet_forward(z, w0_bf, b0, w1_bf, b1))
    assert jnp.allclose(out_bf, ref, atol=3e-2, rtol=3e-2), "bf16-weight mismatch"

    # --- bf16 output option: halves output write-back bytes (v5e win) ---
    out16 = jax.block_until_ready(
        pcnet_forward(z, w0_t, b0, w1_t, b1, out_dtype=jnp.bfloat16))
    assert out16.dtype == jnp.bfloat16
    assert jnp.allclose(out16.astype(jnp.float32), ref, atol=2e-2, rtol=2e-2), \
        "bf16-output mismatch vs reference"

    # --- non-multiple-of-8 batch: padding is now <= 7 rows (single 56-row step) ---
    z_small = z[:52]
    out_small = jax.block_until_ready(pcnet_forward(z_small, w0_t, b0, w1_t, b1))
    assert out_small.shape == (52, rom_n_cells)
    assert jnp.allclose(out_small, ref[:52], atol=5e-3, rtol=5e-3), \
        "padded-batch mismatch vs reference"

    # --- large batch: multi-step grid (even step count -> both TCs on v7x),
    #     ~1024-row tiles, <= 7 padded rows per step ---
    z_big = jax.random.normal(kz, (3000, dim_z), jnp.float32)
    ref_big = pcnet_reference(z_big, w0_t, b0, w1_t, b1)
    out_big = jax.block_until_ready(pcnet_forward(z_big, w0_t, b0, w1_t, b1))
    assert out_big.shape == (3000, rom_n_cells)
    assert jnp.allclose(out_big, ref_big, atol=5e-3, rtol=5e-3), \
        "multi-step mismatch vs reference"

    print("KERNEL_OK")
</pallas_src>

<mosaic_0001>
module attributes {stable_mosaic.version = 11 : i64} {
  func.func @pcnet_kernel(%arg0: i32, %arg1: memref<512x16xf32, #tpu.memory_space<vmem>>, %arg2: memref<16x128xf32, #tpu.memory_space<vmem>>, %arg3: memref<1x128xf32, #tpu.memory_space<vmem>>, %arg4: memref<128x128xf32, #tpu.memory_space<vmem>>, %arg5: memref<1x128xf32, #tpu.memory_space<vmem>>, %arg6: memref<512x128xf32, #tpu.memory_space<vmem>>) attributes {dimension_semantics = [#tpu.dimension_semantics<parallel>], iteration_bounds = array<i64: 1>, scalar_prefetch = 0 : i64, scratch_operands = 0 : i64, tpu.core_type = #tpu.core_type<tc>, window_params = [{transform_indices = @transform_0, window_bounds = array<i64: 512, 16>}, {pipeline_mode = #tpu.pipeline_mode<synchronous>, transform_indices = @transform_1, window_bounds = array<i64: 16, 128>}, {pipeline_mode = #tpu.pipeline_mode<synchronous>, transform_indices = @transform_2, window_bounds = array<i64: 1, 128>}, {pipeline_mode = #tpu.pipeline_mode<synchronous>, transform_indices = @transform_3, window_bounds = array<i64: 128, 128>}, {pipeline_mode = #tpu.pipeline_mode<synchronous>, transform_indices = @transform_4, window_bounds = array<i64: 1, 128>}, {transform_indices = @transform_5, window_bounds = array<i64: 512, 128>}]} {
    %c0 = arith.constant 0 : index
    %c0_0 = arith.constant 0 : index
    %0 = vector.load %arg1[%c0, %c0_0] : memref<512x16xf32, #tpu.memory_space<vmem>>, vector<512x16xf32>
    %c0_1 = arith.constant 0 : index
    %c0_2 = arith.constant 0 : index
    %1 = vector.load %arg2[%c0_1, %c0_2] : memref<16x128xf32, #tpu.memory_space<vmem>>, vector<16x128xf32>
    %cst = arith.constant dense<0.000000e+00> : vector<512x128xf32>
    %2 = tpu.matmul %0, %1, %cst {dimension_numbers = #tpu.dot_dimension_numbers<[1], [0], [0], [1], [0, 0, 1, 1], [], []>} : vector<512x16xf32>, vector<16x128xf32>, vector<512x128xf32> -> vector<512x128xf32>
    %c0_3 = arith.constant 0 : index
    %c0_4 = arith.constant 0 : index
    %3 = vector.load %arg3[%c0_3, %c0_4] : memref<1x128xf32, #tpu.memory_space<vmem>>, vector<1x128xf32>
    %4 = vector.broadcast %3 : vector<1x128xf32> to vector<512x128xf32>
    %5 = arith.addf %2, %4 : vector<512x128xf32>
    %cst_5 = arith.constant 0.000000e+00 : f32
    %6 = vector.broadcast %cst_5 : f32 to vector<512x128xf32>
    %7 = arith.subf %6, %5 : vector<512x128xf32>
    %8 = math.exp %7 : vector<512x128xf32>
    %cst_6 = arith.constant 1.000000e+00 : f32
    %9 = vector.broadcast %cst_6 : f32 to vector<512x128xf32>
    %10 = arith.addf %9, %8 : vector<512x128xf32>
    %cst_7 = arith.constant 1.000000e+00 : f32
    %11 = vector.broadcast %cst_7 : f32 to vector<512x128xf32>
    %12 = arith.divf %11, %10 : vector<512x128xf32>
    %c0_8 = arith.constant 0 : index
    %c0_9 = arith.constant 0 : index
    %13 = vector.load %arg4[%c0_8, %c0_9] : memref<128x128xf32, #tpu.memory_space<vmem>>, vector<128x128xf32>
    %cst_10 = arith.constant dense<0.000000e+00> : vector<512x128xf32>
    %14 = tpu.matmul %12, %13, %cst_10 {dimension_numbers = #tpu.dot_dimension_numbers<[1], [0], [0], [1], [0, 0, 1, 1], [], []>} : vector<512x128xf32>, vector<128x128xf32>, vector<512x128xf32> -> vector<512x128xf32>
    %c0_11 = arith.constant 0 : index
    %c0_12 = arith.constant 0 : index
    %15 = vector.load %arg5[%c0_11, %c0_12] : memref<1x128xf32, #tpu.memory_space<vmem>>, vector<1x128xf32>
    %16 = vector.broadcast %15 : vector<1x128xf32> to vector<512x128xf32>
    %17 = arith.addf %14, %16 : vector<512x128xf32>
    %c0_13 = arith.constant 0 : index
    %c0_14 = arith.constant 0 : index
    %18 = vector.load %arg6[%c0_13, %c0_14] : memref<512x128xf32, #tpu.memory_space<vmem>>, vector<512x128xf32>
    tpu.vector_store %arg6[%c0_13, %c0_14], %17 {strides = array<i32>} : memref<512x128xf32, #tpu.memory_space<vmem>>, vector<512x128xf32>,
    return
  }
  func.func @transform_0(%arg0: i32) -> (i32, i32) {
    %c0_i32 = arith.constant 0 : i32
    %c0_i32_0 = arith.constant 0 : i32
    return %arg0, %c0_i32 : i32, i32
  }
  func.func @transform_1(%arg0: i32) -> (i32, i32) {
    %c0_i32 = arith.constant 0 : i32
    %c0_i32_0 = arith.constant 0 : i32
    %c0_i32_1 = arith.constant 0 : i32
    return %c0_i32, %c0_i32_0 : i32, i32
  }
  func.func @transform_2(%arg0: i32) -> (i32, i32) {
    %c0_i32 = arith.constant 0 : i32
    %c0_i32_0 = arith.constant 0 : i32
    %c0_i32_1 = arith.constant 0 : i32
    return %c0_i32, %c0_i32_0 : i32, i32
  }
  func.func @transform_3(%arg0: i32) -> (i32, i32) {
    %c0_i32 = arith.constant 0 : i32
    %c0_i32_0 = arith.constant 0 : i32
    %c0_i32_1 = arith.constant 0 : i32
    return %c0_i32, %c0_i32_0 : i32, i32
  }
  func.func @transform_4(%arg0: i32) -> (i32, i32) {
    %c0_i32 = arith.constant 0 : i32
    %c0_i32_0 = arith.constant 0 : i32
    %c0_i32_1 = arith.constant 0 : i32
    return %c0_i32, %c0_i32_0 : i32, i32
  }
  func.func @transform_5(%arg0: i32) -> (i32, i32) {
    %c0_i32 = arith.constant 0 : i32
    %c0_i32_0 = arith.constant 0 : i32
    return %arg0, %c0_i32 : i32, i32
  }
}

</mosaic_0001>

<bundles_post_ra>
// kernel: tpu_custom_call.1
= control target key start
LH: loop header
LB: loop body
LE: loop exit
PB: predicated region body
PF: predicated region fallthrough
CT: control target
= control target key end

     0   :  { %vm91_vm0 = vcmask 130048   ;;  %s3581_s0 = inlined_call_operand.vmem [shape: f32[512,16], index: 0, kind: input, shape index: {}]   ;;  %s3582_s1 = inlined_call_operand.vmem [shape: f32[16,128], index: 1, kind: input, shape index: {}]   ;;  %s3583_s2 = inlined_call_operand.vmem [shape: f32[1,128], index: 2, kind: input, shape index: {}]   ;;  %s3584_s3 = inlined_call_operand.vmem [shape: f32[128,128], index: 3, kind: input, shape index: {}]   ;;  %s3585_s4 = inlined_call_operand.vmem [shape: f32[1,128], index: 4, kind: input, shape index: {}]   ;;  %s3586_s5 = inlined_call_operand.hbm [shape: f32[512,128], index: 5, kind: output, shape index: {}]  }
   0x1   :  { %v86_v0 = vld [vmem:[%s3582_s1 + $0x8] sm:$0xff]  ;;  %v85_v1 = vld [vmem:[%s3582_s1] sm:$0xff] }
   0x2   :  { %298 = vmatpush.msra.mxu0 %v86_v0  ;;  %v21_v2 = vld [vmem:[%s3581_s0] sm:$0xff]  ;;  %2084 = vmatpush.msra.mxu3 %v86_v0 }
   0x4   :  { %299 = vmatpush.msra.mxu0 %v85_v1  ;;  %2085 = vmatpush.msra.mxu3 %v85_v1 }
   0x5   :  { %10 = vsyncpa [#allocation3], 0  ;;  %2020 = vmatmul.msk.f32.vlgmr.msra.gmra.mxu0 %vm91_vm0, %v21_v2  ;;  %v22_v3 = vld [vmem:[%s3581_s0 + $0x8] sm:$0xff]  ;;  %v23_v4 = vld [vmem:[%s3581_s0 + $0x10] sm:$0xff]  ;;  %s2008_s11 = sshll.u32 %s3586_s5, 4  ;;  %s2411_s12 = smov 128   ;;  %s2009_s11 = int_to_ptr.hbm [resolvable:$true] %s2008_s11 }
   0x6   :  { %v24_v5 = vld [vmem:[%s3581_s0 + $0x18] sm:$0xff]  ;;  %v25_v6 = vld [vmem:[%s3581_s0 + $0x20] sm:$0xff]  ;;  %v26_v7 = vld [vmem:[%s3581_s0 + $0x28] sm:$0xff]  ;;  %s2412_s13 = smov 8  }
   0x7   :  { %v27_v8 = vld [vmem:[%s3581_s0 + $0x30] sm:$0xff]  ;;  %v28_v9 = vld [vmem:[%s3581_s0 + $0x38] sm:$0xff]  ;;  %v29_v10 = vld [vmem:[%s3581_s0 + $0x40] sm:$0xff] }
   0x8   :  { %v30_v11 = vld [vmem:[%s3581_s0 + $0x48] sm:$0xff]  ;;  %v31_v12 = vld [vmem:[%s3581_s0 + $0x50] sm:$0xff]  ;;  %v32_v13 = vld [vmem:[%s3581_s0 + $0x58] sm:$0xff] }
   0x9   :  { %v33_v14 = vld [vmem:[%s3581_s0 + $0x60] sm:$0xff]  ;;  %v1724_v15 = vld [vmem:[%s3584_s3 + $0x78] sm:$0xff]  ;;  %v1723_v16 = vld [vmem:[%s3584_s3 + $0x70] sm:$0xff] }
   0xa   :  { %1729 = vmatpush.msra.mxu1 %v1724_v15  ;;  %2086 = vmatpush.msra.mxu2 %v1724_v15  ;;  %v1722_v17 = vld [vmem:[%s3584_s3 + $0x68] sm:$0xff]  ;;  %v1721_v18 = vld [vmem:[%s3584_s3 + $0x60] sm:$0xff]  ;;  %v1720_v20 = vld [vmem:[%s3584_s3 + $0x58] sm:$0xff] }
   0xb   :  { %2087 = vmatpush.msrb.mxu3 %v1724_v15  ;;  %v34_v19 = vld [vmem:[%s3581_s0 + $0x68] sm:$0xff]  ;;  %v1719_v21 = vld [vmem:[%s3584_s3 + $0x50] sm:$0xff]  ;;  %v1717_v23 = vld [vmem:[%s3584_s3 + $0x40] sm:$0xff] }
   0xc   :  { %1730 = vmatpush.msra.mxu1 %v1723_v16  ;;  %2088 = vmatpush.msra.mxu2 %v1723_v16  ;;  %v1718_v22 = vld [vmem:[%s3584_s3 + $0x48] sm:$0xff]  ;;  %v35_v24 = vld [vmem:[%s3581_s0 + $0x70] sm:$0xff]  ;;  %v1716_v25 = vld [vmem:[%s3584_s3 + $0x38] sm:$0xff] }
   0xd   :  { %2021 = vmatmul.msk.f32.gmra.mxu0 %vm91_vm0, %v22_v3  ;;  %2089 = vmatpush.msrb.mxu3 %v1723_v16  ;;  %v1715_v26 = vld [vmem:[%s3584_s3 + $0x30] sm:$0xff]  ;;  %v1714_v27 = vld [vmem:[%s3584_s3 + $0x28] sm:$0xff]  ;;  %v1713_v28 = vld [vmem:[%s3584_s3 + $0x20] sm:$0xff] }
   0xe   :  { %1731 = vmatpush.msra.mxu1 %v1722_v17  ;;  %2090 = vmatpush.msra.mxu2 %v1722_v17  ;;  %v36_v29 = vld [vmem:[%s3581_s0 + $0x78] sm:$0xff]  ;;  %v1711_v31 = vld [vmem:[%s3584_s3 + $0x10] sm:$0xff]  ;;  %v2558_v32 = vld [vmem:[%s3583_s2] ss:$0 sm:$0xff] }
   0xf   :  { %2091 = vmatpush.msrb.mxu3 %v1722_v17  ;;  %v1712_v30 = vld [vmem:[%s3584_s3 + $0x18] sm:$0xff]  ;;  %v1710_v33 = vld [vmem:[%s3584_s3 + $0x8] sm:$0xff]  ;;  %v1709_v34 = vld [vmem:[%s3584_s3] sm:$0xff] }
  0x10   :  { %1732 = vmatpush.msra.mxu1 %v1721_v18  ;;  %2092 = vmatpush.msra.mxu2 %v1721_v18  ;;  %v37_v36 = vld [vmem:[%s3581_s0 + $0x80] sm:$0xff]  ;;  %v38_v41 = vld [vmem:[%s3581_s0 + $0x88] sm:$0xff]  ;;  %v39_v48 = vld [vmem:[%s3581_s0 + $0x90] sm:$0xff] }
  0x11   :  { %2093 = vmatpush.msrb.mxu3 %v1721_v18  ;;  %v40_v57 = vld [vmem:[%s3581_s0 + $0x98] sm:$0xff] }
  0x12   :  { %1733 = vmatpush.msra.mxu1 %v1720_v20  ;;  %2094 = vmatpush.msra.mxu2 %v1720_v20 }
  0x13   :  { %2095 = vmatpush.msrb.mxu3 %v1720_v20 }
  0x14   :  { %1734 = vmatpush.msra.mxu1 %v1719_v21  ;;  %2096 = vmatpush.msra.mxu2 %v1719_v21 }
  0x15   :  { %2022 = vmatmul.msk.f32.gmra.mxu0 %vm91_vm0, %v23_v4  ;;  %2097 = vmatpush.msrb.mxu3 %v1719_v21 }
  0x16   :  { %1735 = vmatpush.msra.mxu1 %v1718_v22  ;;  %2098 = vmatpush.msra.mxu2 %v1718_v22 }
  0x17   :  { %2099 = vmatpush.msrb.mxu3 %v1718_v22 }
  0x18   :  { %1736 = vmatpush.msra.mxu1 %v1717_v23  ;;  %2100 = vmatpush.msra.mxu2 %v1717_v23 }
  0x19   :  { %2101 = vmatpush.msrb.mxu3 %v1717_v23 }
  0x1a   :  { %1737 = vmatpush.msra.mxu1 %v1716_v25  ;;  %2102 = vmatpush.msra.mxu2 %v1716_v25 }
  0x1b   :  { %2103 = vmatpush.msrb.mxu3 %v1716_v25 }
  0x1c   :  { %1738 = vmatpush.msra.mxu1 %v1715_v26  ;;  %2104 = vmatpush.msra.mxu2 %v1715_v26 }
  0x1d   :  { %2023 = vmatmul.msk.f32.gmra.mxu0 %vm91_vm0, %v24_v5  ;;  %2105 = vmatpush.msrb.mxu3 %v1715_v26 }
  0x1e   :  { %1739 = vmatpush.msra.mxu1 %v1714_v27  ;;  %2106 = vmatpush.msra.mxu2 %v1714_v27 }
  0x1f   :  { %2107 = vmatpush.msrb.mxu3 %v1714_v27  ;;  %v42_v27 = vld [vmem:[%s3581_s0 + $0xa8] sm:$0xff] }
  0x20   :  { %1740 = vmatpush.msra.mxu1 %v1713_v28  ;;  %2108 = vmatpush.msra.mxu2 %v1713_v28 }
  0x21   :  { %2109 = vmatpush.msrb.mxu3 %v1713_v28 }
  0x22   :  { %1741 = vmatpush.msra.mxu1 %v1712_v30  ;;  %2110 = vmatpush.msra.mxu2 %v1712_v30 }
  0x23   :  { %2111 = vmatpush.msrb.mxu3 %v1712_v30 }
  0x24   :  { %1742 = vmatpush.msra.mxu1 %v1711_v31  ;;  %2112 = vmatpush.msra.mxu2 %v1711_v31 }
  0x25   :  { %2024 = vmatmul.msk.f32.gmra.mxu0 %vm91_vm0, %v25_v6  ;;  %2113 = vmatpush.msrb.mxu3 %v1711_v31 }
  0x26   :  { %1743 = vmatpush.msra.mxu1 %v1710_v33  ;;  %2114 = vmatpush.msra.mxu2 %v1710_v33 }
  0x27   :  { %2115 = vmatpush.msrb.mxu3 %v1710_v33 }
  0x28   :  { %1744 = vmatpush.msra.mxu1 %v1709_v34  ;;  %2116 = vmatpush.msra.mxu2 %v1709_v34 }
  0x29   :  { %2117 = vmatpush.msrb.mxu3 %v1709_v34 }
  0x2d   :  { %2025 = vmatmul.msk.f32.gmra.mxu0 %vm91_vm0, %v26_v7 }
  0x35   :  { %2026 = vmatmul.msk.f32.gmra.mxu0 %vm91_vm0, %v27_v8 }
  0x3d   :  { %2027 = vmatmul.msk.f32.gmra.mxu0 %vm91_vm0, %v28_v9 }
  0x45   :  { %2028 = vmatmul.msk.f32.gmra.mxu0 %vm91_vm0, %v29_v10  ;;  %v41_v10 = vld [vmem:[%s3581_s0 + $0xa0] sm:$0xff] }
  0x4d   :  { %2029 = vmatmul.msk.f32.gmra.mxu0 %vm91_vm0, %v30_v11 }
  0x55   :  { %2030 = vmatmul.msk.f32.gmra.mxu0 %vm91_vm0, %v31_v12 }
  0x5d   :  { %2031 = vmatmul.msk.f32.gmra.mxu0 %vm91_vm0, %v32_v13 }
  0x65   :  { %2032 = vmatmul.msk.f32.gmra.mxu0 %vm91_vm0, %v33_v14 }
  0x6d   :  { %2033 = vmatmul.msk.f32.gmra.mxu0 %vm91_vm0, %v34_v19 }
  0x75   :  { %2034 = vmatmul.msk.f32.gmra.mxu0 %vm91_vm0, %v35_v24 }
  0x7d   :  { %2035 = vmatmul.msk.f32.gmra.mxu0 %vm91_vm0, %v36_v29 }
  0x82   :  { %v301_v35 = vpop.f32.mrf.mxu0 }
  0x83   :  { %v302_v37 = vadd.f32 %v2558_v32, %v301_v35 }
  0x85   :  { %v493_v38 = vsub.f32 0.0, %v302_v37  ;;  %2036 = vmatmul.msk.f32.gmra.mxu0 %vm91_vm0, %v37_v36 }
  0x87   :  { %v557_v39 = vmul.f32 1.442695, %v493_v38 }
  0x89   :  { %2123 = vpow2.f32 %v557_v39 }
  0x8a   :  { %v304_v40 = vpop.f32.mrf.mxu0 }
  0x8b   :  { %v305_v42 = vadd.f32 %v2558_v32, %v304_v40 }
  0x8d   :  { %v494_v43 = vsub.f32 0.0, %v305_v42  ;;  %2037 = vmatmul.msk.f32.gmra.mxu0 %vm91_vm0, %v38_v41 }
  0x8f   :  { %v2124_v44 = vpop.eup %2123  ;;  %v559_v45 = vmul.f32 1.442695, %v494_v43 }
  0x90   :  { %v685_v46 = vadd.f32 1.0, %v2124_v44 }
  0x91   :  { %2125 = vpow2.f32 %v559_v45  ;;  %v43_v45 = vld [vmem:[%s3581_s0 + $0xb0] sm:$0xff] }
  0x92   :  { %2127 = vrcp.f32 %v685_v46  ;;  %v307_v47 = vpop.f32.mrf.mxu0  ;;  %v760_v60 = vand.u32 2147483648, %v685_v46  ;;  %v758_v63 = vand.u32 2147483647, %v685_v46  ;;  %vm754_vm2 = vweird.f32 %v685_v46 }
  0x93   :  { %v308_v49 = vadd.f32 %v2558_v32, %v307_v47 }
  0x94   :  { %v761_v5 = vor.u32 1.1754944e-38, %v760_v60  ;;  %vm759_vm4 = vcmp.eq.f32.partialorder %v758_v63, 8.507059e+37 }
  0x95   :  { %v495_v50 = vsub.f32 0.0, %v308_v49  ;;  %2038 = vmatmul.msk.f32.gmra.mxu0 %vm91_vm0, %v39_v48 }
  0x97   :  { %v2126_v51 = vpop.eup %2125  ;;  %v561_v52 = vmul.f32 1.442695, %v495_v50 }
  0x98   :  { %v2128_v53 = vpop.eup %2127  ;;  %v686_v54 = vadd.f32 1.0, %v2126_v51 }
  0x99   :  { %2129 = vpow2.f32 %v561_v52  ;;  %v750_v55 = vmul.f32 %v2128_v53, %v685_v46  ;;  %vm755_vm1 = vweird.f32 %v2128_v53 }
  0x9a   :  { %2131 = vrcp.f32 %v686_v54  ;;  %v310_v56 = vpop.f32.mrf.mxu0  ;;  %vm756_vm3 = vmor %vm754_vm2, %vm755_vm1  ;;  %v775_v13 = vand.u32 2147483648, %v686_v54  ;;  %v773_v16 = vand.u32 2147483647, %v686_v54  ;;  %vm769_vm6 = vweird.f32 %v686_v54 }
  0x9b   :  { %v311_v58 = vadd.f32 %v2558_v32, %v310_v56  ;;  %v751_v59 = vsub.f32 1.0, %v750_v55 }
  0x9c   :  { %v776_v22 = vor.u32 1.1754944e-38, %v775_v13  ;;  %vm774_vm8 = vcmp.eq.f32.partialorder %v773_v16, 8.507059e+37 }
  0x9d   :  { %v496_v61 = vsub.f32 0.0, %v311_v58  ;;  %2039 = vmatmul.msk.f32.gmra.mxu0 %vm91_vm0, %v40_v57  ;;  %v752_v62 = vmul.f32 %v2128_v53, %v751_v59 }
  0x9f   :  { %v2130_v0 = vpop.eup %2129  ;;  %v563_v1 = vmul.f32 1.442695, %v496_v61  ;;  %v753_v2 = vadd.f32 %v2128_v53, %v752_v62  ;;  %v44_v62 = vld [vmem:[%s3581_s0 + $0xb8] sm:$0xff] }
  0xa0   :  { %v2132_v3 = vpop.eup %2131  ;;  %v687_v4 = vadd.f32 1.0, %v2130_v0 }
  0xa1   :  { %2133 = vpow2.f32 %v563_v1  ;;  %v757_v6 = vsel %vm756_vm3, %v2128_v53, %v753_v2  ;;  %v765_v7 = vmul.f32 %v2132_v3, %v686_v54  ;;  %vm770_vm5 = vweird.f32 %v2132_v3 }
  0xa2   :  { %2135 = vrcp.f32 %v687_v4  ;;  %v313_v8 = vpop.f32.mrf.mxu0  ;;  %v762_v9 = vsel %vm759_vm4, %v761_v5, %v757_v6  ;;  %vm771_vm7 = vmor %vm769_vm6, %vm770_vm5  ;;  %v790_v30 = vand.u32 2147483648, %v687_v4  ;;  %v788_v34 = vand.u32 2147483647, %v687_v4 }
  0xa3   :  { %v314_v11 = vadd.f32 %v2558_v32, %v313_v8  ;;  %1745 = vmatmul.f32.vlgmr.msra.gmra.mxu1 %v762_v9  ;;  %v766_v12 = vsub.f32 1.0, %v765_v7  ;;  %vm784_vm10 = vweird.f32 %v687_v4 }
  0xa4   :  { %v791_v40 = vor.u32 1.1754944e-38, %v790_v30  ;;  %vm789_vm12 = vcmp.eq.f32.partialorder %v788_v34, 8.507059e+37 }
  0xa5   :  { %v497_v14 = vsub.f32 0.0, %v314_v11  ;;  %2040 = vmatmul.msk.f32.gmra.mxu0 %vm91_vm0, %v41_v10  ;;  %v767_v15 = vmul.f32 %v2132_v3, %v766_v12 }
  0xa7   :  { %v2134_v17 = vpop.eup %2133  ;;  %v565_v18 = vmul.f32 1.442695, %v497_v14  ;;  %v768_v19 = vadd.f32 %v2132_v3, %v767_v15  ;;  %v45_v15 = vld [vmem:[%s3581_s0 + $0xc0] sm:$0xff] }
  0xa8   :  { %v2136_v20 = vpop.eup %2135  ;;  %v688_v21 = vadd.f32 1.0, %v2134_v17 }
  0xa9   :  { %2137 = vpow2.f32 %v565_v18  ;;  %v772_v23 = vsel %vm771_vm7, %v2132_v3, %v768_v19  ;;  %v780_v24 = vmul.f32 %v2136_v20, %v687_v4  ;;  %vm785_vm9 = vweird.f32 %v2136_v20 }
  0xaa   :  { %2139 = vrcp.f32 %v688_v21  ;;  %v316_v25 = vpop.f32.mrf.mxu0  ;;  %v777_v26 = vsel %vm774_vm8, %v776_v22, %v772_v23  ;;  %vm786_vm11 = vmor %vm784_vm10, %vm785_vm9  ;;  %v805_v48 = vand.u32 2147483648, %v688_v21  ;;  %v803_v51 = vand.u32 2147483647, %v688_v21 }
  0xab   :  { %v317_v28 = vadd.f32 %v2558_v32, %v316_v25  ;;  %1748 = vmatmul.f32.gmra.mxu1 %v777_v26  ;;  %v781_v29 = vsub.f32 1.0, %v780_v24  ;;  %vm799_vm14 = vweird.f32 %v688_v21 }
  0xac   :  { %v806_v57 = vor.u32 1.1754944e-38, %v805_v48  ;;  %vm804_vm1 = vcmp.eq.f32.partialorder %v803_v51, 8.507059e+37  ;;  %v55_v51 = vld [vmem:[%s3581_s0 + $0x110] sm:$0xff] }
  0xad   :  { %v498_v31 = vsub.f32 0.0, %v317_v28  ;;  %2041 = vmatmul.msk.f32.gmra.mxu0 %vm91_vm0, %v42_v27  ;;  %v782_v33 = vmul.f32 %v2136_v20, %v781_v29  ;;  %2054 = vmatmul.msk.f32.vlgmr.msra.gmra.mxu3 %vm91_vm0, %v55_v51 }
  0xaf   :  { %v2138_v35 = vpop.eup %2137  ;;  %v567_v36 = vmul.f32 1.442695, %v498_v31  ;;  %v783_v37 = vadd.f32 %v2136_v20, %v782_v33  ;;  %v46_v33 = vld [vmem:[%s3581_s0 + $0xc8] sm:$0xff] }
  0xb0   :  { %v2140_v38 = vpop.eup %2139  ;;  %v689_v39 = vadd.f32 1.0, %v2138_v35 }
  0xb1   :  { %2141 = vpow2.f32 %v567_v36  ;;  %v787_v41 = vsel %vm786_vm11, %v2136_v20, %v783_v37  ;;  %v795_v42 = vmul.f32 %v2140_v38, %v688_v21  ;;  %vm800_vm13 = vweird.f32 %v2140_v38 }
  0xb2   :  { %2143 = vrcp.f32 %v689_v39  ;;  %v319_v43 = vpop.f32.mrf.mxu0  ;;  %v792_v44 = vsel %vm789_vm12, %v791_v40, %v787_v41  ;;  %vm801_vm15 = vmor %vm799_vm14, %vm800_vm13  ;;  %v820_v1 = vand.u32 2147483648, %v689_v39  ;;  %v818_v4 = vand.u32 2147483647, %v689_v39 }
  0xb3   :  { %v320_v46 = vadd.f32 %v2558_v32, %v319_v43  ;;  %1751 = vmatmul.f32.gmra.mxu1 %v792_v44  ;;  %v796_v47 = vsub.f32 1.0, %v795_v42  ;;  %vm814_vm3 = vweird.f32 %v689_v39 }
  0xb4   :  { %v821_v10 = vor.u32 1.1754944e-38, %v820_v1  ;;  %vm819_vm5 = vcmp.eq.f32.partialorder %v818_v4, 8.507059e+37  ;;  %v48_v4 = vld [vmem:[%s3581_s0 + $0xd8] sm:$0xff] }
  0xb5   :  { %v499_v49 = vsub.f32 0.0, %v320_v46  ;;  %2042 = vmatmul.msk.f32.gmra.mxu0 %vm91_vm0, %v43_v45  ;;  %v797_v50 = vmul.f32 %v2140_v38, %v796_v47 }
  0xb7   :  { %v2142_v52 = vpop.eup %2141  ;;  %v569_v53 = vmul.f32 1.442695, %v499_v49  ;;  %v798_v54 = vadd.f32 %v2140_v38, %v797_v50  ;;  %v47_v50 = vld [vmem:[%s3581_s0 + $0xd0] sm:$0xff] }
  0xb8   :  { %v2144_v55 = vpop.eup %2143  ;;  %v690_v56 = vadd.f32 1.0, %v2142_v52 }
  0xb9   :  { %2145 = vpow2.f32 %v569_v53  ;;  %v802_v58 = vsel %vm801_vm15, %v2140_v38, %v798_v54  ;;  %v810_v59 = vmul.f32 %v2144_v55, %v689_v39  ;;  %vm815_vm2 = vweird.f32 %v2144_v55 }
  0xba   :  { %2147 = vrcp.f32 %v690_v56  ;;  %v322_v60 = vpop.f32.mrf.mxu0  ;;  %v807_v61 = vsel %vm804_vm1, %v806_v57, %v802_v58  ;;  %vm816_vm4 = vmor %vm814_vm3, %vm815_vm2  ;;  %v835_v18 = vand.u32 2147483648, %v690_v56  ;;  %v833_v21 = vand.u32 2147483647, %v690_v56 }
  0xbb   :  { %v323_v63 = vadd.f32 %v2558_v32, %v322_v60  ;;  %1754 = vmatmul.f32.gmra.mxu1 %v807_v61  ;;  %v811_v0 = vsub.f32 1.0, %v810_v59  ;;  %vm829_vm7 = vweird.f32 %v690_v56 }
  0xbc   :  { %v836_v27 = vor.u32 1.1754944e-38, %v835_v18  ;;  %vm834_vm9 = vcmp.eq.f32.partialorder %v833_v21, 8.507059e+37 }
  0xbd   :  { %v500_v2 = vsub.f32 0.0, %v323_v63  ;;  %2043 = vmatmul.msk.f32.gmra.mxu0 %vm91_vm0, %v44_v62  ;;  %v812_v3 = vmul.f32 %v2144_v55, %v811_v0 }
  0xbf   :  { %v2146_v5 = vpop.eup %2145  ;;  %v571_v6 = vmul.f32 1.442695, %v500_v2  ;;  %v813_v7 = vadd.f32 %v2144_v55, %v812_v3 }
  0xc0   :  { %v2148_v8 = vpop.eup %2147  ;;  %v691_v9 = vadd.f32 1.0, %v2146_v5  ;;  %v56_v5 = vld [vmem:[%s3581_s0 + $0x118] sm:$0xff] }
  0xc1   :  { %2149 = vpow2.f32 %v571_v6  ;;  %v817_v11 = vsel %vm816_vm4, %v2144_v55, %v813_v7  ;;  %v825_v12 = vmul.f32 %v2148_v8, %v690_v56  ;;  %vm830_vm6 = vweird.f32 %v2148_v8  ;;  %2055 = vmatmul.msk.f32.gmra.mxu3 %vm91_vm0, %v56_v5 }
  0xc2   :  { %2151 = vrcp.f32 %v691_v9  ;;  %v325_v13 = vpop.f32.mrf.mxu0  ;;  %v822_v14 = vsel %vm819_vm5, %v821_v10, %v817_v11  ;;  %vm831_vm8 = vmor %vm829_vm7, %vm830_vm6  ;;  %v850_v36 = vand.u32 2147483648, %v691_v9  ;;  %v848_v39 = vand.u32 2147483647, %v691_v9 }
  0xc3   :  { %v326_v16 = vadd.f32 %v2558_v32, %v325_v13  ;;  %1757 = vmatmul.f32.gmra.mxu1 %v822_v14  ;;  %v826_v17 = vsub.f32 1.0, %v825_v12  ;;  %vm844_vm11 = vweird.f32 %v691_v9 }
  0xc4   :  { %v851_v45 = vor.u32 1.1754944e-38, %v850_v36  ;;  %vm849_vm13 = vcmp.eq.f32.partialorder %v848_v39, 8.507059e+37 }
  0xc5   :  { %v501_v19 = vsub.f32 0.0, %v326_v16  ;;  %2044 = vmatmul.msk.f32.gmra.mxu0 %vm91_vm0, %v45_v15  ;;  %v827_v20 = vmul.f32 %v2148_v8, %v826_v17 }
  0xc7   :  { %v2150_v22 = vpop.eup %2149  ;;  %v573_v23 = vmul.f32 1.442695, %v501_v19  ;;  %v828_v24 = vadd.f32 %v2148_v8, %v827_v20 }
  0xc8   :  { %v2152_v25 = vpop.eup %2151  ;;  %v692_v26 = vadd.f32 1.0, %v2150_v22  ;;  %v49_v22 = vld [vmem:[%s3581_s0 + $0xe0] sm:$0xff] }
  0xc9   :  { %2153 = vpow2.f32 %v573_v23  ;;  %v832_v28 = vsel %vm831_vm8, %v2148_v8, %v828_v24  ;;  %v840_v29 = vmul.f32 %v2152_v25, %v691_v9  ;;  %vm845_vm10 = vweird.f32 %v2152_v25  ;;  %v57_v23 = vld [vmem:[%s3581_s0 + $0x120] sm:$0xff] }
  0xca   :  { %2155 = vrcp.f32 %v692_v26  ;;  %v328_v30 = vpop.f32.mrf.mxu0  ;;  %v837_v31 = vsel %vm834_vm9, %v836_v27, %v832_v28  ;;  %vm846_vm12 = vmor %vm844_vm11, %vm845_vm10  ;;  %v865_v54 = vand.u32 2147483648, %v692_v26  ;;  %v863_v57 = vand.u32 2147483647, %v692_v26  ;;  %2056 = vmatmul.msk.f32.gmra.mxu3 %vm91_vm0, %v57_v23 }
  0xcb   :  { %v329_v34 = vadd.f32 %v2558_v32, %v328_v30  ;;  %1760 = vmatmul.f32.gmra.mxu1 %v837_v31  ;;  %v841_v35 = vsub.f32 1.0, %v840_v29  ;;  %vm859_vm15 = vweird.f32 %v692_v26 }
  0xcc   :  { %v866_v63 = vor.u32 1.1754944e-38, %v865_v54  ;;  %vm864_vm2 = vcmp.eq.f32.partialorder %v863_v57, 8.507059e+37 }
  0xcd   :  { %v502_v37 = vsub.f32 0.0, %v329_v34  ;;  %2045 = vmatmul.msk.f32.gmra.mxu0 %vm91_vm0, %v46_v33  ;;  %v842_v38 = vmul.f32 %v2152_v25, %v841_v35 }
  0xcf   :  { %v2154_v40 = vpop.eup %2153  ;;  %v575_v41 = vmul.f32 1.442695, %v502_v37  ;;  %v843_v42 = vadd.f32 %v2152_v25, %v842_v38 }
  0xd0   :  { %v2156_v43 = vpop.eup %2155  ;;  %v693_v44 = vadd.f32 1.0, %v2154_v40 }
  0xd1   :  { %2157 = vpow2.f32 %v575_v41  ;;  %v847_v46 = vsel %vm846_vm12, %v2152_v25, %v843_v42  ;;  %v855_v47 = vmul.f32 %v2156_v43, %v692_v26  ;;  %vm860_vm14 = vweird.f32 %v2156_v43  ;;  %v50_v41 = vld [vmem:[%s3581_s0 + $0xe8] sm:$0xff] }
  0xd2   :  { %2159 = vrcp.f32 %v693_v44  ;;  %v331_v48 = vpop.f32.mrf.mxu0  ;;  %v852_v49 = vsel %vm849_vm13, %v851_v45, %v847_v46  ;;  %vm861_vm1 = vmor %vm859_vm15, %vm860_vm14  ;;  %v880_v8 = vand.u32 2147483648, %v693_v44  ;;  %v878_v11 = vand.u32 2147483647, %v693_v44  ;;  %v58_v42 = vld [vmem:[%s3581_s0 + $0x128] sm:$0xff] }
  0xd3   :  { %v332_v52 = vadd.f32 %v2558_v32, %v331_v48  ;;  %1763 = vmatmul.f32.gmra.mxu1 %v852_v49  ;;  %v856_v53 = vsub.f32 1.0, %v855_v47  ;;  %vm874_vm4 = vweird.f32 %v693_v44  ;;  %2057 = vmatmul.msk.f32.gmra.mxu3 %vm91_vm0, %v58_v42 }
  0xd4   :  { %v881_v17 = vor.u32 1.1754944e-38, %v880_v8  ;;  %vm879_vm6 = vcmp.eq.f32.partialorder %v878_v11, 8.507059e+37 }
  0xd5   :  { %v503_v55 = vsub.f32 0.0, %v332_v52  ;;  %2046 = vmatmul.msk.f32.gmra.mxu0 %vm91_vm0, %v47_v50  ;;  %v857_v56 = vmul.f32 %v2156_v43, %v856_v53 }
  0xd7   :  { %v2158_v58 = vpop.eup %2157  ;;  %v577_v59 = vmul.f32 1.442695, %v503_v55  ;;  %v858_v60 = vadd.f32 %v2156_v43, %v857_v56 }
  0xd8   :  { %v2160_v61 = vpop.eup %2159  ;;  %v694_v62 = vadd.f32 1.0, %v2158_v58 }
  0xd9   :  { %2161 = vpow2.f32 %v577_v59  ;;  %v862_v0 = vsel %vm861_vm1, %v2156_v43, %v858_v60  ;;  %v870_v1 = vmul.f32 %v2160_v61, %v693_v44  ;;  %vm875_vm3 = vweird.f32 %v2160_v61  ;;  %v51_v59 = vld [vmem:[%s3581_s0 + $0xf0] sm:$0xff] }
  0xda   :  { %2163 = vrcp.f32 %v694_v62  ;;  %v334_v2 = vpop.f32.mrf.mxu0  ;;  %v867_v3 = vsel %vm864_vm2, %v866_v63, %v862_v0  ;;  %vm876_vm5 = vmor %vm874_vm4, %vm875_vm3  ;;  %v895_v26 = vand.u32 2147483648, %v694_v62  ;;  %v893_v29 = vand.u32 2147483647, %v694_v62  ;;  %v59_v60 = vld [vmem:[%s3581_s0 + $0x130] sm:$0xff] }
  0xdb   :  { %v335_v6 = vadd.f32 %v2558_v32, %v334_v2  ;;  %1766 = vmatmul.f32.gmra.mxu1 %v867_v3  ;;  %v871_v7 = vsub.f32 1.0, %v870_v1  ;;  %vm889_vm8 = vweird.f32 %v694_v62  ;;  %2058 = vmatmul.msk.f32.gmra.mxu3 %vm91_vm0, %v59_v60 }
  0xdc   :  { %v896_v36 = vor.u32 1.1754944e-38, %v895_v26  ;;  %vm894_vm10 = vcmp.eq.f32.partialorder %v893_v29, 8.507059e+37 }
  0xdd   :  { %v504_v9 = vsub.f32 0.0, %v335_v6  ;;  %2047 = vmatmul.msk.f32.gmra.mxu0 %vm91_vm0, %v48_v4  ;;  %v872_v10 = vmul.f32 %v2160_v61, %v871_v7 }
  0xdf   :  { %v2162_v12 = vpop.eup %2161  ;;  %v579_v13 = vmul.f32 1.442695, %v504_v9  ;;  %v873_v14 = vadd.f32 %v2160_v61, %v872_v10 }
  0xe0   :  { %v2164_v15 = vpop.eup %2163  ;;  %v695_v16 = vadd.f32 1.0, %v2162_v12 }
  0xe1   :  { %2165 = vpow2.f32 %v579_v13  ;;  %v877_v18 = vsel %vm876_vm5, %v2160_v61, %v873_v14  ;;  %v885_v19 = vmul.f32 %v2164_v15, %v694_v62  ;;  %vm890_vm7 = vweird.f32 %v2164_v15  ;;  %v52_v13 = vld [vmem:[%s3581_s0 + $0xf8] sm:$0xff] }
  0xe2   :  { %2167 = vrcp.f32 %v695_v16  ;;  %v337_v20 = vpop.f32.mrf.mxu0  ;;  %v882_v21 = vsel %vm879_vm6, %v881_v17, %v877_v18  ;;  %vm891_vm9 = vmor %vm889_vm8, %vm890_vm7  ;;  %v910_v45 = vand.u32 2147483648, %v695_v16  ;;  %v908_v48 = vand.u32 2147483647, %v695_v16  ;;  %v60_v14 = vld [vmem:[%s3581_s0 + $0x138] sm:$0xff] }
  0xe3   :  { %v338_v24 = vadd.f32 %v2558_v32, %v337_v20  ;;  %1769 = vmatmul.f32.gmra.mxu1 %v882_v21  ;;  %v886_v25 = vsub.f32 1.0, %v885_v19  ;;  %vm904_vm12 = vweird.f32 %v695_v16  ;;  %2059 = vmatmul.msk.f32.gmra.mxu3 %vm91_vm0, %v60_v14 }
  0xe4   :  { %v911_v54 = vor.u32 1.1754944e-38, %v910_v45  ;;  %vm909_vm14 = vcmp.eq.f32.partialorder %v908_v48, 8.507059e+37 }
  0xe5   :  { %v505_v27 = vsub.f32 0.0, %v338_v24  ;;  %2048 = vmatmul.msk.f32.gmra.mxu0 %vm91_vm0, %v49_v22  ;;  %v887_v28 = vmul.f32 %v2164_v15, %v886_v25 }
  0xe7   :  { %v2166_v30 = vpop.eup %2165  ;;  %v581_v31 = vmul.f32 1.442695, %v505_v27  ;;  %v888_v33 = vadd.f32 %v2164_v15, %v887_v28 }
  0xe8   :  { %v2168_v34 = vpop.eup %2167  ;;  %v696_v35 = vadd.f32 1.0, %v2166_v30 }
  0xe9   :  { %2169 = vpow2.f32 %v581_v31  ;;  %v892_v37 = vsel %vm891_vm9, %v2164_v15, %v888_v33  ;;  %v900_v38 = vmul.f32 %v2168_v34, %v695_v16  ;;  %vm905_vm11 = vweird.f32 %v2168_v34  ;;  %v53_v31 = vld [vmem:[%s3581_s0 + $0x100] sm:$0xff] }
  0xea   :  { %2171 = vrcp.f32 %v696_v35  ;;  %v340_v39 = vpop.f32.mrf.mxu0  ;;  %v897_v40 = vsel %vm894_vm10, %v896_v36, %v892_v37  ;;  %vm906_vm13 = vmor %vm904_vm12, %vm905_vm11  ;;  %v925_v63 = vand.u32 2147483648, %v696_v35  ;;  %v923_v2 = vand.u32 2147483647, %v696_v35  ;;  %v61_v33 = vld [vmem:[%s3581_s0 + $0x140] sm:$0xff] }
  0xeb   :  { %v341_v43 = vadd.f32 %v2558_v32, %v340_v39  ;;  %1772 = vmatmul.f32.gmra.mxu1 %v897_v40  ;;  %v901_v44 = vsub.f32 1.0, %v900_v38  ;;  %vm919_vm1 = vweird.f32 %v696_v35  ;;  %2060 = vmatmul.msk.f32.gmra.mxu3 %vm91_vm0, %v61_v33 }
  0xec   :  { %v926_v8 = vor.u32 1.1754944e-38, %v925_v63  ;;  %vm924_vm3 = vcmp.eq.f32.partialorder %v923_v2, 8.507059e+37 }
  0xed   :  { %v506_v46 = vsub.f32 0.0, %v341_v43  ;;  %2049 = vmatmul.msk.f32.gmra.mxu0 %vm91_vm0, %v50_v41  ;;  %v902_v47 = vmul.f32 %v2168_v34, %v901_v44 }
  0xef   :  { %v2170_v49 = vpop.eup %2169  ;;  %v583_v50 = vmul.f32 1.442695, %v506_v46  ;;  %v903_v51 = vadd.f32 %v2168_v34, %v902_v47 }
  0xf0   :  { %v2172_v52 = vpop.eup %2171  ;;  %v697_v53 = vadd.f32 1.0, %v2170_v49 }
  0xf1   :  { %2173 = vpow2.f32 %v583_v50  ;;  %v907_v55 = vsel %vm906_vm13, %v2168_v34, %v903_v51  ;;  %v915_v56 = vmul.f32 %v2172_v52, %v696_v35  ;;  %vm920_vm15 = vweird.f32 %v2172_v52  ;;  %v54_v50 = vld [vmem:[%s3581_s0 + $0x108] sm:$0xff] }
  0xf2   :  { %2175 = vrcp.f32 %v697_v53  ;;  %v343_v57 = vpop.f32.mrf.mxu0  ;;  %v912_v58 = vsel %vm909_vm14, %v911_v54, %v907_v55  ;;  %vm921_vm2 = vmor %vm919_vm1, %vm920_vm15  ;;  %v940_v17 = vand.u32 2147483648, %v697_v53  ;;  %v938_v20 = vand.u32 2147483647, %v697_v53  ;;  %v62_v51 = vld [vmem:[%s3581_s0 + $0x148] sm:$0xff] }
  0xf3   :  { %v344_v61 = vadd.f32 %v2558_v32, %v343_v57  ;;  %1775 = vmatmul.f32.gmra.mxu1 %v912_v58  ;;  %v916_v62 = vsub.f32 1.0, %v915_v56  ;;  %vm934_vm5 = vweird.f32 %v697_v53  ;;  %2061 = vmatmul.msk.f32.gmra.mxu3 %vm91_vm0, %v62_v51 }
  0xf4   :  { %v941_v26 = vor.u32 1.1754944e-38, %v940_v17  ;;  %vm939_vm7 = vcmp.eq.f32.partialorder %v938_v20, 8.507059e+37 }
  0xf5   :  { %v507_v0 = vsub.f32 0.0, %v344_v61  ;;  %2050 = vmatmul.msk.f32.gmra.mxu0 %vm91_vm0, %v51_v59  ;;  %v917_v1 = vmul.f32 %v2172_v52, %v916_v62 }
  0xf7   :  { %v2174_v3 = vpop.eup %2173  ;;  %v585_v4 = vmul.f32 1.442695, %v507_v0  ;;  %v918_v5 = vadd.f32 %v2172_v52, %v917_v1 }
  0xf8   :  { %v2176_v6 = vpop.eup %2175  ;;  %v698_v7 = vadd.f32 1.0, %v2174_v3 }
  0xf9   :  { %2177 = vpow2.f32 %v585_v4  ;;  %v922_v9 = vsel %vm921_vm2, %v2172_v52, %v918_v5  ;;  %v930_v10 = vmul.f32 %v2176_v6, %v697_v53  ;;  %vm935_vm4 = vweird.f32 %v2176_v6  ;;  %v63_v4 = vld [vmem:[%s3581_s0 + $0x150] sm:$0xff] }
  0xfa   :  { %2179 = vrcp.f32 %v698_v7  ;;  %v346_v11 = vpop.f32.mrf.mxu0  ;;  %v927_v12 = vsel %vm924_vm3, %v926_v8, %v922_v9  ;;  %vm936_vm6 = vmor %vm934_vm5, %vm935_vm4  ;;  %v955_v36 = vand.u32 2147483648, %v698_v7  ;;  %v953_v39 = vand.u32 2147483647, %v698_v7 }
  0xfb   :  { %v347_v15 = vadd.f32 %v2558_v32, %v346_v11  ;;  %1778 = vmatmul.f32.gmra.mxu1 %v927_v12  ;;  %v931_v16 = vsub.f32 1.0, %v930_v10  ;;  %vm949_vm9 = vweird.f32 %v698_v7  ;;  %2062 = vmatmul.msk.f32.gmra.mxu3 %vm91_vm0, %v63_v4 }
  0xfc   :  { %v956_v45 = vor.u32 1.1754944e-38, %v955_v36  ;;  %vm954_vm11 = vcmp.eq.f32.partialorder %v953_v39, 8.507059e+37 }
  0xfd   :  { %v508_v18 = vsub.f32 0.0, %v347_v15  ;;  %2051 = vmatmul.msk.f32.gmra.mxu0 %vm91_vm0, %v52_v13  ;;  %v932_v19 = vmul.f32 %v2176_v6, %v931_v16 }
  0xff   :  { %v2178_v21 = vpop.eup %2177  ;;  %v587_v22 = vmul.f32 1.442695, %v508_v18  ;;  %v933_v23 = vadd.f32 %v2176_v6, %v932_v19 }
 0x100   :  { %v2180_v24 = vpop.eup %2179  ;;  %v699_v25 = vadd.f32 1.0, %v2178_v21  ;;  %v64_v21 = vld [vmem:[%s3581_s0 + $0x158] sm:$0xff] }
 0x101   :  { %2181 = vpow2.f32 %v587_v22  ;;  %v937_v27 = vsel %vm936_vm6, %v2176_v6, %v933_v23  ;;  %v945_v28 = vmul.f32 %v2180_v24, %v698_v7  ;;  %vm950_vm8 = vweird.f32 %v2180_v24 }
 0x102   :  { %2183 = vrcp.f32 %v699_v25  ;;  %v349_v29 = vpop.f32.mrf.mxu0  ;;  %v942_v30 = vsel %vm939_vm7, %v941_v26, %v937_v27  ;;  %vm951_vm10 = vmor %vm949_vm9, %vm950_vm8  ;;  %v970_v54 = vand.u32 2147483648, %v699_v25  ;;  %v968_v57 = vand.u32 2147483647, %v699_v25  ;;  %v2701_v27 = vld [vmem:[%s3585_s4] ss:$0 sm:$0xff] }
 0x103   :  { %v350_v34 = vadd.f32 %v2558_v32, %v349_v29  ;;  %1781 = vmatmul.f32.gmra.mxu1 %v942_v30  ;;  %v946_v35 = vsub.f32 1.0, %v945_v28  ;;  %vm964_vm13 = vweird.f32 %v699_v25  ;;  %2063 = vmatmul.msk.f32.gmra.mxu3 %vm91_vm0, %v64_v21 }
 0x104   :  { %v971_v63 = vor.u32 1.1754944e-38, %v970_v54  ;;  %vm969_vm15 = vcmp.eq.f32.partialorder %v968_v57, 8.507059e+37 }
 0x105   :  { %v509_v37 = vsub.f32 0.0, %v350_v34  ;;  %2052 = vmatmul.msk.f32.gmra.mxu0 %vm91_vm0, %v53_v31  ;;  %v947_v38 = vmul.f32 %v2180_v24, %v946_v35 }
 0x107   :  { %v2182_v40 = vpop.eup %2181  ;;  %v589_v41 = vmul.f32 1.442695, %v509_v37  ;;  %v948_v42 = vadd.f32 %v2180_v24, %v947_v38 }
 0x108   :  { %v2184_v43 = vpop.eup %2183  ;;  %v700_v44 = vadd.f32 1.0, %v2182_v40 }
 0x109   :  { %2185 = vpow2.f32 %v589_v41  ;;  %v952_v46 = vsel %vm951_vm10, %v2180_v24, %v948_v42  ;;  %v960_v47 = vmul.f32 %v2184_v43, %v699_v25  ;;  %vm965_vm12 = vweird.f32 %v2184_v43  ;;  %v65_v42 = vld [vmem:[%s3581_s0 + $0x160] sm:$0xff] }
 0x10a   :  { %2187 = vrcp.f32 %v700_v44  ;;  %v352_v48 = vpop.f32.mrf.mxu0  ;;  %v957_v49 = vsel %vm954_vm11, %v956_v45, %v952_v46  ;;  %vm966_vm14 = vmor %vm964_vm13, %vm965_vm12  ;;  %v985_v7 = vand.u32 2147483648, %v700_v44  ;;  %v983_v10 = vand.u32 2147483647, %v700_v44 }
 0x10b   :  { %v353_v52 = vadd.f32 %v2558_v32, %v352_v48  ;;  %1784 = vmatmul.f32.gmra.mxu1 %v957_v49  ;;  %v961_v53 = vsub.f32 1.0, %v960_v47  ;;  %vm979_vm2 = vweird.f32 %v700_v44  ;;  %2064 = vmatmul.msk.f32.gmra.mxu3 %vm91_vm0, %v65_v42 }
 0x10c   :  { %v986_v16 = vor.u32 1.1754944e-38, %v985_v7  ;;  %vm984_vm4 = vcmp.eq.f32.partialorder %v983_v10, 8.507059e+37 }
 0x10d   :  { %v510_v55 = vsub.f32 0.0, %v353_v52  ;;  %2053 = vmatmul.msk.f32.gmra.mxu0 %vm91_vm0, %v54_v50  ;;  %v962_v56 = vmul.f32 %v2184_v43, %v961_v53 }
 0x10f   :  { %v2186_v58 = vpop.eup %2185  ;;  %v591_v59 = vmul.f32 1.442695, %v510_v55  ;;  %v963_v60 = vadd.f32 %v2184_v43, %v962_v56 }
 0x110   :  { %v2188_v61 = vpop.eup %2187  ;;  %v701_v62 = vadd.f32 1.0, %v2186_v58 }
 0x111   :  { %2189 = vpow2.f32 %v591_v59  ;;  %v967_v0 = vsel %vm966_vm14, %v2184_v43, %v963_v60  ;;  %v975_v1 = vmul.f32 %v2188_v61, %v700_v44  ;;  %vm980_vm1 = vweird.f32 %v2188_v61  ;;  %v66_v60 = vld [vmem:[%s3581_s0 + $0x168] sm:$0xff] }
 0x112   :  { %2191 = vrcp.f32 %v701_v62  ;;  %v355_v2 = vpop.f32.mrf.mxu0  ;;  %v972_v3 = vsel %vm969_vm15, %v971_v63, %v967_v0  ;;  %vm981_vm3 = vmor %vm979_vm2, %vm980_vm1  ;;  %v998_v24 = vand.u32 2147483647, %v701_v62  ;;  %v1000_v25 = vand.u32 2147483648, %v701_v62 }
 0x113   :  { %v356_v5 = vadd.f32 %v2558_v32, %v355_v2  ;;  %1787 = vmatmul.f32.gmra.mxu1 %v972_v3  ;;  %v976_v6 = vsub.f32 1.0, %v975_v1  ;;  %vm994_vm6 = vweird.f32 %v701_v62  ;;  %2065 = vmatmul.msk.f32.gmra.mxu3 %vm91_vm0, %v66_v60 }
 0x114   :  { %vm999_vm8 = vcmp.eq.f32.partialorder %v998_v24, 8.507059e+37  ;;  %v1001_v36 = vor.u32 1.1754944e-38, %v1000_v25 }
 0x115   :  { %v511_v8 = vsub.f32 0.0, %v356_v5  ;;  %v977_v9 = vmul.f32 %v2188_v61, %v976_v6 }
 0x117   :  { %v2190_v11 = vpop.eup %2189  ;;  %v593_v12 = vmul.f32 1.442695, %v511_v8  ;;  %v978_v13 = vadd.f32 %v2188_v61, %v977_v9 }
 0x118   :  { %v2192_v14 = vpop.eup %2191  ;;  %v702_v15 = vadd.f32 1.0, %v2190_v11 }
 0x119   :  { %2193 = vpow2.f32 %v593_v12  ;;  %v982_v17 = vsel %vm981_vm3, %v2188_v61, %v978_v13  ;;  %v990_v18 = vmul.f32 %v2192_v14, %v701_v62  ;;  %vm995_vm5 = vweird.f32 %v2192_v14  ;;  %v2716_v61 = vld [vmem:[%s3583_s2] ss:$0 sm:$0xff] }
 0x11a   :  { %2195 = vrcp.f32 %v702_v15  ;;  %v358_v19 = vpop.f32.mrf.mxu0  ;;  %v987_v20 = vsel %vm984_vm4, %v986_v16, %v982_v17  ;;  %vm996_vm7 = vmor %vm994_vm6, %vm995_vm5  ;;  %v1013_v45 = vand.u32 2147483647, %v702_v15  ;;  %v1015_v46 = vand.u32 2147483648, %v702_v15  ;;  %v67_v16 = vld [vmem:[%s3581_s0 + $0x170] sm:$0xff] }
 0x11b   :  { %v359_v22 = vadd.f32 %v2558_v32, %v358_v19  ;;  %1790 = vmatmul.f32.gmra.mxu1 %v987_v20  ;;  %v991_v23 = vsub.f32 1.0, %v990_v18  ;;  %vm1009_vm10 = vweird.f32 %v702_v15  ;;  %2066 = vmatmul.msk.f32.gmra.mxu3 %vm91_vm0, %v67_v16 }
 0x11c   :  { %vm1014_vm12 = vcmp.eq.f32.partialorder %v1013_v45, 8.507059e+37  ;;  %v1016_v55 = vor.u32 1.1754944e-38, %v1015_v46 }
 0x11d   :  { %v512_v26 = vsub.f32 0.0, %v359_v22  ;;  %v992_v28 = vmul.f32 %v2192_v14, %v991_v23 }
 0x11f   :  { %v2194_v29 = vpop.eup %2193  ;;  %v595_v30 = vmul.f32 1.442695, %v512_v26  ;;  %v993_v31 = vadd.f32 %v2192_v14, %v992_v28 }
 0x120   :  { %v2196_v33 = vpop.eup %2195  ;;  %v703_v34 = vadd.f32 1.0, %v2194_v29  ;;  %v1746_v35 = vpop.f32.mrf.mxu1 }
 0x121   :  { %2197 = vpow2.f32 %v595_v30  ;;  %v1747_v37 = vadd.f32 %v2701_v27, %v1746_v35  ;;  %v997_v38 = vsel %vm996_vm7, %v2192_v14, %v993_v31  ;;  %v1005_v39 = vmul.f32 %v2196_v33, %v702_v15 }
 0x122   :  { %2199 = vrcp.f32 %v703_v34  ;;  %v361_v40 = vpop.f32.mrf.mxu0  ;;  %v1002_v41 = vsel %vm999_vm8, %v1001_v36, %v997_v38  ;;  %vm1010_vm9 = vweird.f32 %v2196_v33  ;;  %v1028_v0 = vand.u32 2147483647, %v703_v34 }
 0x123   :  { %1938 = vst [vmem:[#allocation2] sm:$0xff] %v1747_v37  ;;  %v362_v43 = vadd.f32 %v2558_v32, %v361_v40  ;;  %1793 = vmatmul.f32.gmra.mxu1 %v1002_v41  ;;  %v1006_v44 = vsub.f32 1.0, %v1005_v39  ;;  %vm1011_vm11 = vmor %vm1009_vm10, %vm1010_vm9  ;;  %v1030_v1 = vand.u32 2147483648, %v703_v34  ;;  %vm1024_vm14 = vweird.f32 %v703_v34  ;;  %v68_v37 = vld [vmem:[%s3581_s0 + $0x178] sm:$0xff] }
 0x124   :  { %vm1029_vm1 = vcmp.eq.f32.partialorder %v1028_v0, 8.507059e+37  ;;  %2067 = vmatmul.msk.f32.gmra.mxu3 %vm91_vm0, %v68_v37 }
 0x125   :  { %v513_v47 = vsub.f32 0.0, %v362_v43  ;;  %v1007_v48 = vmul.f32 %v2196_v33, %v1006_v44  ;;  %v1031_v10 = vor.u32 1.1754944e-38, %v1030_v1 }
 0x127   :  { %v2198_v49 = vpop.eup %2197  ;;  %v597_v50 = vmul.f32 1.442695, %v513_v47  ;;  %v1008_v51 = vadd.f32 %v2196_v33, %v1007_v48 }
 0x128   :  { %v2200_v52 = vpop.eup %2199  ;;  %v704_v53 = vadd.f32 1.0, %v2198_v49  ;;  %v1749_v54 = vpop.f32.mrf.mxu1 }
 0x129   :  { %2201 = vpow2.f32 %v597_v50  ;;  %v1750_v32 = vadd.f32 %v2701_v27, %v1749_v54  ;;  %v1012_v56 = vsel %vm1011_vm11, %v2196_v33, %v1008_v51  ;;  %v1020_v57 = vmul.f32 %v2200_v52, %v703_v34 }
 0x12a   :  { %2203 = vrcp.f32 %v704_v53  ;;  %v364_v58 = vpop.f32.mrf.mxu0  ;;  %v1017_v59 = vsel %vm1014_vm12, %v1016_v55, %v1012_v56  ;;  %vm1025_vm13 = vweird.f32 %v2200_v52  ;;  %v1043_v19 = vand.u32 2147483647, %v704_v53 }
 0x12b   :  { %1939 = vst [vmem:[#allocation2 + $0x8] sm:$0xff] %v1750_v32  ;;  %v365_v62 = vadd.f32 %v2716_v61, %v364_v58  ;;  %1796 = vmatmul.f32.gmra.mxu1 %v1017_v59  ;;  %v1021_v63 = vsub.f32 1.0, %v1020_v57  ;;  %vm1026_vm15 = vmor %vm1024_vm14, %vm1025_vm13  ;;  %v1045_v20 = vand.u32 2147483648, %v704_v53  ;;  %vm1039_vm3 = vweird.f32 %v704_v53  ;;  %v69_v32 = vld [vmem:[%s3581_s0 + $0x180] sm:$0xff] }
 0x12c   :  { %vm1044_vm5 = vcmp.eq.f32.partialorder %v1043_v19, 8.507059e+37  ;;  %2068 = vmatmul.msk.f32.gmra.mxu3 %vm91_vm0, %v69_v32 }
 0x12d   :  { %v514_v2 = vsub.f32 0.0, %v365_v62  ;;  %v1022_v3 = vmul.f32 %v2200_v52, %v1021_v63  ;;  %v1046_v30 = vor.u32 1.1754944e-38, %v1045_v20 }
 0x12f   :  { %v2202_v4 = vpop.eup %2201  ;;  %v599_v5 = vmul.f32 1.442695, %v514_v2  ;;  %v1023_v6 = vadd.f32 %v2200_v52, %v1022_v3 }
 0x130   :  { %v2204_v7 = vpop.eup %2203  ;;  %v705_v8 = vadd.f32 1.0, %v2202_v4  ;;  %v1752_v9 = vpop.f32.mrf.mxu1 }
 0x131   :  { %2205 = vpow2.f32 %v599_v5  ;;  %v1753_v11 = vadd.f32 %v2701_v27, %v1752_v9  ;;  %v1027_v12 = vsel %vm1026_vm15, %v2200_v52, %v1023_v6  ;;  %v1035_v13 = vmul.f32 %v2204_v7, %v704_v53 }
 0x132   :  { %2207 = vrcp.f32 %v705_v8  ;;  %v367_v14 = vpop.f32.mrf.mxu0  ;;  %v1032_v15 = vsel %vm1029_vm1, %v1031_v10, %v1027_v12  ;;  %vm1040_vm2 = vweird.f32 %v2204_v7  ;;  %v1058_v40 = vand.u32 2147483647, %v705_v8 }
 0x133   :  { %1940 = vst [vmem:[#allocation2 + $0x10] sm:$0xff] %v1753_v11  ;;  %v368_v17 = vadd.f32 %v2716_v61, %v367_v14  ;;  %1799 = vmatmul.f32.gmra.mxu1 %v1032_v15  ;;  %v1036_v18 = vsub.f32 1.0, %v1035_v13  ;;  %vm1041_vm4 = vmor %vm1039_vm3, %vm1040_vm2  ;;  %v1060_v41 = vand.u32 2147483648, %v705_v8  ;;  %vm1054_vm7 = vweird.f32 %v705_v8  ;;  %v70_v11 = vld [vmem:[%s3581_s0 + $0x188] sm:$0xff] }
 0x134   :  { %vm1059_vm9 = vcmp.eq.f32.partialorder %v1058_v40, 8.507059e+37  ;;  %2069 = vmatmul.msk.f32.gmra.mxu3 %vm91_vm0, %v70_v11 }
 0x135   :  { %v515_v21 = vsub.f32 0.0, %v368_v17  ;;  %v1037_v22 = vmul.f32 %v2204_v7, %v1036_v18  ;;  %v1061_v50 = vor.u32 1.1754944e-38, %v1060_v41 }
 0x137   :  { %v2206_v23 = vpop.eup %2205  ;;  %v601_v24 = vmul.f32 1.442695, %v515_v21  ;;  %v1038_v25 = vadd.f32 %v2204_v7, %v1037_v22 }
 0x138   :  { %v2208_v26 = vpop.eup %2207  ;;  %v706_v28 = vadd.f32 1.0, %v2206_v23  ;;  %v1755_v29 = vpop.f32.mrf.mxu1 }
 0x139   :  { %2209 = vpow2.f32 %v601_v24  ;;  %v1756_v31 = vadd.f32 %v2701_v27, %v1755_v29  ;;  %v1042_v33 = vsel %vm1041_vm4, %v2204_v7, %v1038_v25  ;;  %v1050_v34 = vmul.f32 %v2208_v26, %v705_v8 }
 0x13a   :  { %2211 = vrcp.f32 %v706_v28  ;;  %v370_v35 = vpop.f32.mrf.mxu0  ;;  %v1047_v36 = vsel %vm1044_vm5, %v1046_v30, %v1042_v33  ;;  %vm1055_vm6 = vweird.f32 %v2208_v26  ;;  %v1073_v58 = vand.u32 2147483647, %v706_v28 }
 0x13b   :  { %1941 = vst [vmem:[#allocation2 + $0x18] sm:$0xff] %v1756_v31  ;;  %v371_v38 = vadd.f32 %v2716_v61, %v370_v35  ;;  %1802 = vmatmul.f32.gmra.mxu1 %v1047_v36  ;;  %v1051_v39 = vsub.f32 1.0, %v1050_v34  ;;  %vm1056_vm8 = vmor %vm1054_vm7, %vm1055_vm6  ;;  %v1075_v59 = vand.u32 2147483648, %v706_v28  ;;  %vm1069_vm11 = vweird.f32 %v706_v28  ;;  %v71_v31 = vld [vmem:[%s3581_s0 + $0x190] sm:$0xff] }
 0x13c   :  { %vm1074_vm13 = vcmp.eq.f32.partialorder %v1073_v58, 8.507059e+37  ;;  %2070 = vmatmul.msk.f32.gmra.mxu3 %vm91_vm0, %v71_v31  ;;  %v74_v31 = vld [vmem:[%s3581_s0 + $0x1a8] sm:$0xff] }
 0x13d   :  { %v516_v42 = vsub.f32 0.0, %v371_v38  ;;  %v1052_v43 = vmul.f32 %v2208_v26, %v1051_v39  ;;  %v1076_v5 = vor.u32 1.1754944e-38, %v1075_v59  ;;  %v2750_v39 = vpop.f32.mrf.mxu3 }
 0x13f   :  { %v2210_v44 = vpop.eup %2209  ;;  %v603_v45 = vmul.f32 1.442695, %v516_v42  ;;  %v1053_v46 = vadd.f32 %v2208_v26, %v1052_v43 }
 0x140   :  { %v2212_v47 = vpop.eup %2211  ;;  %v707_v48 = vadd.f32 1.0, %v2210_v44  ;;  %v1758_v49 = vpop.f32.mrf.mxu1 }
 0x141   :  { %2213 = vpow2.f32 %v603_v45  ;;  %v1759_v51 = vadd.f32 %v2701_v27, %v1758_v49  ;;  %v1057_v52 = vsel %vm1056_vm8, %v2208_v26, %v1053_v46  ;;  %v1065_v53 = vmul.f32 %v2212_v47, %v706_v28 }
 0x142   :  { %2215 = vrcp.f32 %v707_v48  ;;  %v373_v54 = vpop.f32.mrf.mxu0  ;;  %v1062_v55 = vsel %vm1059_vm9, %v1061_v50, %v1057_v52  ;;  %vm1070_vm10 = vweird.f32 %v2212_v47  ;;  %v1088_v14 = vand.u32 2147483647, %v707_v48  ;;  %v72_v52 = vld [vmem:[%s3581_s0 + $0x198] sm:$0xff] }
 0x143   :  { %1942 = vst [vmem:[#allocation2 + $0x20] sm:$0xff] %v1759_v51  ;;  %v374_v56 = vadd.f32 %v2716_v61, %v373_v54  ;;  %1805 = vmatmul.f32.gmra.mxu1 %v1062_v55  ;;  %v1066_v57 = vsub.f32 1.0, %v1065_v53  ;;  %vm1071_vm12 = vmor %vm1069_vm11, %vm1070_vm10  ;;  %v1090_v15 = vand.u32 2147483648, %v707_v48  ;;  %vm1084_vm15 = vweird.f32 %v707_v48 }
 0x144   :  { %vm1089_vm2 = vcmp.eq.f32.partialorder %v1088_v14, 8.507059e+37  ;;  %2071 = vmatmul.msk.f32.gmra.mxu3 %vm91_vm0, %v72_v52 }
 0x145   :  { %v517_v60 = vsub.f32 0.0, %v374_v56  ;;  %v1067_v62 = vmul.f32 %v2212_v47, %v1066_v57  ;;  %v1091_v24 = vor.u32 1.1754944e-38, %v1090_v15 }
 0x147   :  { %v2214_v63 = vpop.eup %2213  ;;  %v605_v0 = vmul.f32 1.442695, %v517_v60  ;;  %v1068_v1 = vadd.f32 %v2212_v47, %v1067_v62  ;;  %v2758_v62 = vpop.f32.mrf.mxu3 }
 0x148   :  { %v2216_v2 = vpop.eup %2215  ;;  %v708_v3 = vadd.f32 1.0, %v2214_v63  ;;  %v1761_v4 = vpop.f32.mrf.mxu1 }
 0x149   :  { %2217 = vpow2.f32 %v605_v0  ;;  %v1762_v6 = vadd.f32 %v2701_v27, %v1761_v4  ;;  %v1072_v7 = vsel %vm1071_vm12, %v2212_v47, %v1068_v1  ;;  %v1080_v8 = vmul.f32 %v2216_v2, %v707_v48 }
 0x14a   :  { %2219 = vrcp.f32 %v708_v3  ;;  %v376_v9 = vpop.f32.mrf.mxu0  ;;  %v1077_v10 = vsel %vm1074_vm13, %v1076_v5, %v1072_v7  ;;  %vm1085_vm14 = vweird.f32 %v2216_v2  ;;  %v1103_v35 = vand.u32 2147483647, %v708_v3 }
 0x14b   :  { %1943 = vst [vmem:[#allocation2 + $0x28] sm:$0xff] %v1762_v6  ;;  %v377_v12 = vadd.f32 %v2716_v61, %v376_v9  ;;  %1808 = vmatmul.f32.gmra.mxu1 %v1077_v10  ;;  %v1081_v13 = vsub.f32 1.0, %v1080_v8  ;;  %vm1086_vm1 = vmor %vm1084_vm15, %vm1085_vm14  ;;  %v1105_v36 = vand.u32 2147483648, %v708_v3  ;;  %vm1099_vm4 = vweird.f32 %v708_v3  ;;  %v73_v10 = vld [vmem:[%s3581_s0 + $0x1a0] sm:$0xff] }
 0x14c   :  { %vm1104_vm6 = vcmp.eq.f32.partialorder %v1103_v35, 8.507059e+37  ;;  %2072 = vmatmul.msk.f32.gmra.mxu3 %vm91_vm0, %v73_v10  ;;  %v76_v10 = vld [vmem:[%s3581_s0 + $0x1b8] sm:$0xff] }
 0x14d   :  { %v518_v16 = vsub.f32 0.0, %v377_v12  ;;  %v1082_v17 = vmul.f32 %v2216_v2, %v1081_v13  ;;  %v1106_v46 = vor.u32 1.1754944e-38, %v1105_v36 }
 0x14f   :  { %v2218_v18 = vpop.eup %2217  ;;  %v607_v19 = vmul.f32 1.442695, %v518_v16  ;;  %v1083_v20 = vadd.f32 %v2216_v2, %v1082_v17 }
 0x150   :  { %v2220_v21 = vpop.eup %2219  ;;  %v709_v22 = vadd.f32 1.0, %v2218_v18  ;;  %v1764_v23 = vpop.f32.mrf.mxu1 }
 0x151   :  { %2221 = vpow2.f32 %v607_v19  ;;  %v1765_v25 = vadd.f32 %v2701_v27, %v1764_v23  ;;  %v1087_v26 = vsel %vm1086_vm1, %v2216_v2, %v1083_v20  ;;  %v1095_v28 = vmul.f32 %v2220_v21, %v708_v3  ;;  %v2766_v18 = vpop.f32.mrf.mxu3 }
 0x152   :  { %2223 = vrcp.f32 %v709_v22  ;;  %v379_v29 = vpop.f32.mrf.mxu0  ;;  %v1092_v30 = vsel %vm1089_vm2, %v1091_v24, %v1087_v26  ;;  %vm1100_vm3 = vweird.f32 %v2220_v21  ;;  %v1118_v55 = vand.u32 2147483647, %v709_v22 }
 0x153   :  { %1944 = vst [vmem:[#allocation2 + $0x30] sm:$0xff] %v1765_v25  ;;  %v380_v33 = vadd.f32 %v2716_v61, %v379_v29  ;;  %1811 = vmatmul.f32.gmra.mxu1 %v1092_v30  ;;  %v1096_v34 = vsub.f32 1.0, %v1095_v28  ;;  %vm1101_vm5 = vmor %vm1099_vm4, %vm1100_vm3  ;;  %v1120_v32 = vand.u32 2147483648, %v709_v22  ;;  %vm1114_vm8 = vweird.f32 %v709_v22 }
 0x154   :  { %vm1119_vm10 = vcmp.eq.f32.partialorder %v1118_v55, 8.507059e+37  ;;  %2073 = vmatmul.msk.f32.gmra.mxu3 %vm91_vm0, %v74_v31  ;;  %v407_v31 = vadd.f32 %v2716_v61, %v2758_v62 }
 0x155   :  { %v519_v37 = vsub.f32 0.0, %v380_v33  ;;  %v1097_v38 = vmul.f32 %v2220_v21, %v1096_v34  ;;  %v1121_v2 = vor.u32 1.1754944e-38, %v1120_v32 }
 0x157   :  { %v2222_v40 = vpop.eup %2221  ;;  %v609_v41 = vmul.f32 1.442695, %v519_v37  ;;  %v1098_v42 = vadd.f32 %v2220_v21, %v1097_v38 }
 0x158   :  { %v2224_v43 = vpop.eup %2223  ;;  %v710_v44 = vadd.f32 1.0, %v2222_v40  ;;  %v1767_v45 = vpop.f32.mrf.mxu1 }
 0x159   :  { %2225 = vpow2.f32 %v609_v41  ;;  %v1768_v47 = vadd.f32 %v2701_v27, %v1767_v45  ;;  %v1102_v48 = vsel %vm1101_vm5, %v2220_v21, %v1098_v42  ;;  %v1110_v49 = vmul.f32 %v2224_v43, %v709_v22  ;;  %v2774_v41 = vpop.f32.mrf.mxu3 }
 0x15a   :  { %2227 = vrcp.f32 %v710_v44  ;;  %v382_v50 = vpop.f32.mrf.mxu0  ;;  %v1107_v51 = vsel %vm1104_vm6, %v1106_v46, %v1102_v48  ;;  %vm1115_vm7 = vweird.f32 %v2224_v43  ;;  %v1133_v11 = vand.u32 2147483647, %v710_v44 }
 0x15b   :  { %1945 = vst [vmem:[#allocation2 + $0x38] sm:$0xff] %v1768_v47  ;;  %v383_v53 = vadd.f32 %v2716_v61, %v382_v50  ;;  %1814 = vmatmul.f32.gmra.mxu1 %v1107_v51  ;;  %v1111_v54 = vsub.f32 1.0, %v1110_v49  ;;  %vm1116_vm9 = vmor %vm1114_vm8, %vm1115_vm7  ;;  %v1135_v12 = vand.u32 2147483648, %v710_v44  ;;  %vm1129_vm12 = vweird.f32 %v710_v44 }
 0x15c   :  { %vm1134_vm14 = vcmp.eq.f32.partialorder %v1133_v11, 8.507059e+37  ;;  %v404_v11 = vadd.f32 %v2716_v61, %v2750_v39 }
 0x15d   :  { %v520_v56 = vsub.f32 0.0, %v383_v53  ;;  %v1112_v57 = vmul.f32 %v2224_v43, %v1111_v54  ;;  %v1136_v22 = vor.u32 1.1754944e-38, %v1135_v12  ;;  %v75_v53 = vld [vmem:[%s3581_s0 + $0x1b0] sm:$0xff] }
 0x15e   :  { %2074 = vmatmul.msk.f32.gmra.mxu3 %vm91_vm0, %v75_v53  ;;  %v527_v39 = vsub.f32 0.0, %v404_v11 }
 0x15f   :  { %v2226_v58 = vpop.eup %2225  ;;  %v611_v59 = vmul.f32 1.442695, %v520_v56  ;;  %v1113_v60 = vadd.f32 %v2224_v43, %v1112_v57 }
 0x160   :  { %v2228_v63 = vpop.eup %2227  ;;  %v711_v0 = vadd.f32 1.0, %v2226_v58  ;;  %v1770_v1 = vpop.f32.mrf.mxu1 }
 0x161   :  { %2229 = vpow2.f32 %v611_v59  ;;  %v1771_v3 = vadd.f32 %v2701_v27, %v1770_v1  ;;  %v1117_v4 = vsel %vm1116_vm9, %v2224_v43, %v1113_v60  ;;  %v1125_v5 = vmul.f32 %v2228_v63, %v710_v44  ;;  %v2785_v60 = vpop.f32.mrf.mxu3 }
 0x162   :  { %2231 = vrcp.f32 %v711_v0  ;;  %v385_v6 = vpop.f32.mrf.mxu0  ;;  %v1122_v7 = vsel %vm1119_vm10, %v1121_v2, %v1117_v4  ;;  %vm1130_vm11 = vweird.f32 %v2228_v63  ;;  %v1148_v33 = vand.u32 2147483647, %v711_v0 }
 0x163   :  { %1946 = vst [vmem:[#allocation2 + $0x40] sm:$0xff] %v1771_v3  ;;  %v386_v8 = vadd.f32 %v2716_v61, %v385_v6  ;;  %1817 = vmatmul.f32.gmra.mxu1 %v1122_v7  ;;  %v1126_v9 = vsub.f32 1.0, %v1125_v5  ;;  %vm1131_vm13 = vmor %vm1129_vm12, %vm1130_vm11  ;;  %v1150_v34 = vand.u32 2147483648, %v711_v0  ;;  %vm1144_vm1 = vweird.f32 %v711_v0 }
 0x164   :  { %vm1149_vm3 = vcmp.eq.f32.partialorder %v1148_v33, 8.507059e+37 }
 0x165   :  { %v521_v13 = vsub.f32 0.0, %v386_v8  ;;  %v1127_v14 = vmul.f32 %v2228_v63, %v1126_v9  ;;  %v1151_v45 = vor.u32 1.1754944e-38, %v1150_v34 }
 0x166   :  { %2075 = vmatmul.msk.f32.gmra.mxu3 %vm91_vm0, %v76_v10 }
 0x167   :  { %v2230_v15 = vpop.eup %2229  ;;  %v613_v16 = vmul.f32 1.442695, %v521_v13  ;;  %v1128_v17 = vadd.f32 %v2228_v63, %v1127_v14 }
 0x168   :  { %v2232_v19 = vpop.eup %2231  ;;  %v712_v20 = vadd.f32 1.0, %v2230_v15  ;;  %v1773_v21 = vpop.f32.mrf.mxu1 }
 0x169   :  { %2233 = vpow2.f32 %v613_v16  ;;  %v1774_v23 = vadd.f32 %v2701_v27, %v1773_v21  ;;  %v1132_v24 = vsel %vm1131_vm13, %v2228_v63, %v1128_v17  ;;  %v1140_v25 = vmul.f32 %v2232_v19, %v711_v0 }
 0x16a   :  { %2235 = vrcp.f32 %v712_v20  ;;  %v388_v26 = vpop.f32.mrf.mxu0  ;;  %v1137_v28 = vsel %vm1134_vm14, %v1136_v22, %v1132_v24  ;;  %vm1145_vm15 = vweird.f32 %v2232_v19  ;;  %v1163_v54 = vand.u32 2147483647, %v712_v20 }
 0x16b   :  { %1947 = vst [vmem:[#allocation2 + $0x48] sm:$0xff] %v1774_v23  ;;  %v389_v29 = vadd.f32 %v2716_v61, %v388_v26  ;;  %1820 = vmatmul.f32.gmra.mxu1 %v1137_v28  ;;  %v1141_v30 = vsub.f32 1.0, %v1140_v25  ;;  %vm1146_vm2 = vmor %vm1144_vm1, %vm1145_vm15  ;;  %v1165_v55 = vand.u32 2147483648, %v712_v20  ;;  %vm1159_vm5 = vweird.f32 %v712_v20 }
 0x16c   :  { %vm1164_vm7 = vcmp.eq.f32.partialorder %v1163_v54, 8.507059e+37 }
 0x16d   :  { %v522_v35 = vsub.f32 0.0, %v389_v29  ;;  %v1142_v36 = vmul.f32 %v2232_v19, %v1141_v30  ;;  %v1166_v2 = vor.u32 1.1754944e-38, %v1165_v55 }
 0x16f   :  { %v2234_v37 = vpop.eup %2233  ;;  %v615_v38 = vmul.f32 1.442695, %v522_v35  ;;  %v1143_v40 = vadd.f32 %v2232_v19, %v1142_v36  ;;  %v77_v35 = vld [vmem:[%s3581_s0 + $0x1c0] sm:$0xff]  ;;  %v625_v36 = vmul.f32 1.442695, %v527_v39 }
 0x170   :  { %v2236_v42 = vpop.eup %2235  ;;  %v2776_v43 = vadd.f32 1.0, %v2234_v37  ;;  %v1776_v44 = vpop.f32.mrf.mxu1  ;;  %2076 = vmatmul.msk.f32.gmra.mxu3 %vm91_vm0, %v77_v35 }
 0x171   :  { %2237 = vpow2.f32 %v615_v38  ;;  %v1777_v46 = vadd.f32 %v2701_v27, %v1776_v44  ;;  %v1147_v47 = vsel %vm1146_vm2, %v2232_v19, %v1143_v40  ;;  %v1155_v48 = vmul.f32 %v2236_v42, %v712_v20  ;;  %v2802_v20 = vpop.f32.mrf.mxu3 }
 0x172   :  { %2239 = vrcp.f32 %v2776_v43  ;;  %v391_v49 = vpop.f32.mrf.mxu0  ;;  %v1152_v50 = vsel %vm1149_vm3, %v1151_v45, %v1147_v47  ;;  %vm1160_vm4 = vweird.f32 %v2236_v42  ;;  %v1178_v12 = vand.u32 2147483647, %v2776_v43 }
 0x173   :  { %1948 = vst [vmem:[#allocation2 + $0x50] sm:$0xff] %v1777_v46  ;;  %v392_v51 = vadd.f32 %v2716_v61, %v391_v49  ;;  %1823 = vmatmul.f32.gmra.mxu1 %v1152_v50  ;;  %v1156_v52 = vsub.f32 1.0, %v1155_v48  ;;  %vm1161_vm6 = vmor %vm1159_vm5, %vm1160_vm4  ;;  %v1180_v13 = vand.u32 2147483648, %v2776_v43  ;;  %vm1174_vm9 = vweird.f32 %v2776_v43 }
 0x174   :  { %vm1179_vm11 = vcmp.eq.f32.partialorder %v1178_v12, 8.507059e+37 }
 0x175   :  { %v523_v32 = vsub.f32 0.0, %v392_v51  ;;  %v1157_v56 = vmul.f32 %v2236_v42, %v1156_v52  ;;  %v1181_v24 = vor.u32 1.1754944e-38, %v1180_v13 }
 0x177   :  { %v2238_v57 = vpop.eup %2237  ;;  %v617_v58 = vmul.f32 1.442695, %v523_v32  ;;  %v1158_v59 = vadd.f32 %v2236_v42, %v1157_v56 }
 0x178   :  { %v2240_v63 = vpop.eup %2239  ;;  %v2787_v0 = vadd.f32 1.0, %v2238_v57  ;;  %v1779_v1 = vpop.f32.mrf.mxu1 }
 0x179   :  { %2241 = vpow2.f32 %v617_v58  ;;  %v1780_v3 = vadd.f32 %v2701_v27, %v1779_v1  ;;  %v1162_v4 = vsel %vm1161_vm6, %v2236_v42, %v1158_v59  ;;  %v1170_v5 = vmul.f32 %v2240_v63, %v2776_v43  ;;  %v2819_v46 = vpop.f32.mrf.mxu3  ;;  %v78_v58 = vld [vmem:[%s3581_s0 + $0x1c8] sm:$0xff] }
 0x17a   :  { %2243 = vrcp.f32 %v2787_v0  ;;  %v394_v6 = vpop.f32.mrf.mxu0  ;;  %v1167_v7 = vsel %vm1164_vm7, %v1166_v2, %v1162_v4  ;;  %vm1175_vm8 = vweird.f32 %v2240_v63  ;;  %v1193_v37 = vand.u32 2147483647, %v2787_v0  ;;  %2077 = vmatmul.msk.f32.gmra.mxu3 %vm91_vm0, %v78_v58 }
 0x17b   :  { %1949 = vst [vmem:[#allocation2 + $0x58] sm:$0xff] %v1780_v3  ;;  %v395_v8 = vadd.f32 %v2716_v61, %v394_v6  ;;  %1826 = vmatmul.f32.gmra.mxu1 %v1167_v7  ;;  %v1171_v9 = vsub.f32 1.0, %v1170_v5  ;;  %vm1176_vm10 = vmor %vm1174_vm9, %vm1175_vm8  ;;  %v1195_v38 = vand.u32 2147483648, %v2787_v0  ;;  %v528_v43 = vsub.f32 0.0, %v407_v31 }
 0x17c   :  { %vm1189_vm13 = vweird.f32 %v2787_v0  ;;  %vm1194_vm15 = vcmp.eq.f32.partialorder %v1193_v37, 8.507059e+37  ;;  %v410_v59 = vadd.f32 %v2716_v61, %v2766_v18 }
 0x17d   :  { %v524_v14 = vsub.f32 0.0, %v395_v8  ;;  %v1172_v15 = vmul.f32 %v2240_v63, %v1171_v9  ;;  %v1196_v50 = vor.u32 1.1754944e-38, %v1195_v38  ;;  %v627_v32 = vmul.f32 1.442695, %v528_v43 }
 0x17e   :  { %v529_v9 = vsub.f32 0.0, %v410_v59 }
 0x17f   :  { %v2242_v16 = vpop.eup %2241  ;;  %v619_v17 = vmul.f32 1.442695, %v524_v14  ;;  %v1173_v19 = vadd.f32 %v2240_v63, %v1172_v15 }
 0x180   :  { %v2244_v21 = vpop.eup %2243  ;;  %v2804_v22 = vadd.f32 1.0, %v2242_v16  ;;  %v1782_v23 = vpop.f32.mrf.mxu1 }
 0x181   :  { %2245 = vpow2.f32 %v619_v17  ;;  %v1783_v25 = vadd.f32 %v2701_v27, %v1782_v23  ;;  %v1177_v26 = vsel %vm1176_vm10, %v2240_v63, %v1173_v19  ;;  %v1185_v28 = vmul.f32 %v2244_v21, %v2787_v0  ;;  %v2836_v7 = vpop.f32.mrf.mxu3  ;;  %v79_v19 = vld [vmem:[%s3581_s0 + $0x1d0] sm:$0xff] }
 0x182   :  { %2247 = vrcp.f32 %v2804_v22  ;;  %v397_v29 = vpop.f32.mrf.mxu0  ;;  %v1182_v30 = vsel %vm1179_vm11, %v1181_v24, %v1177_v26  ;;  %vm1190_vm12 = vweird.f32 %v2244_v21  ;;  %v1208_v63 = vand.u32 2147483647, %v2804_v22  ;;  %2078 = vmatmul.msk.f32.gmra.mxu3 %vm91_vm0, %v79_v19 }
 0x183   :  { %1950 = vst [vmem:[#allocation2 + $0x60] sm:$0xff] %v1783_v25  ;;  %v398_v33 = vadd.f32 %v2716_v61, %v397_v29  ;;  %1829 = vmatmul.f32.gmra.mxu1 %v1182_v30  ;;  %v1186_v34 = vsub.f32 1.0, %v1185_v28  ;;  %2249 = vpow2.f32 %v625_v36  ;;  %vm1191_vm14 = vmor %vm1189_vm13, %vm1190_vm12  ;;  %v1210_v0 = vand.u32 2147483648, %v2804_v22 }
 0x184   :  { %vm1204_vm2 = vweird.f32 %v2804_v22  ;;  %vm1209_vm4 = vcmp.eq.f32.partialorder %v1208_v63, 8.507059e+37 }
 0x185   :  { %v525_v40 = vsub.f32 0.0, %v398_v33  ;;  %v1187_v42 = vmul.f32 %v2244_v21, %v1186_v34  ;;  %v1211_v11 = vor.u32 1.1754944e-38, %v1210_v0 }
 0x187   :  { %v2246_v62 = vpop.eup %2245  ;;  %v621_v44 = vmul.f32 1.442695, %v525_v40  ;;  %v1188_v45 = vadd.f32 %v2244_v21, %v1187_v42 }
 0x188   :  { %v2248_v47 = vpop.eup %2247  ;;  %v2821_v48 = vadd.f32 1.0, %v2246_v62  ;;  %v1785_v49 = vpop.f32.mrf.mxu1  ;;  %v80_v62 = vld [vmem:[%s3581_s0 + $0x1d8] sm:$0xff] }
 0x189   :  { %2251 = vpow2.f32 %v621_v44  ;;  %v1786_v51 = vadd.f32 %v2701_v27, %v1785_v49  ;;  %v1192_v52 = vsel %vm1191_vm14, %v2244_v21, %v1188_v45  ;;  %v1200_v53 = vmul.f32 %v2248_v47, %v2804_v22  ;;  %v2250_v3 = vpop.eup %2249  ;;  %v2855_v29 = vpop.f32.mrf.mxu3 }
 0x18a   :  { %2253 = vrcp.f32 %v2821_v48  ;;  %v400_v54 = vpop.f32.mrf.mxu0  ;;  %v1197_v55 = vsel %vm1194_vm15, %v1196_v50, %v1192_v52  ;;  %vm1205_vm1 = vweird.f32 %v2248_v47  ;;  %v2842_v15 = vadd.f32 1.0, %v2250_v3  ;;  %2079 = vmatmul.msk.f32.gmra.mxu3 %vm91_vm0, %v80_v62 }
 0x18b   :  { %1951 = vst [vmem:[#allocation2 + $0x68] sm:$0xff] %v1786_v51  ;;  %v401_v56 = vadd.f32 %v2716_v61, %v400_v54  ;;  %1832 = vmatmul.f32.gmra.mxu1 %v1197_v55  ;;  %v1201_v57 = vsub.f32 1.0, %v1200_v53  ;;  %2255 = vpow2.f32 %v627_v32  ;;  %vm1206_vm3 = vmor %vm1204_vm2, %vm1205_vm1  ;;  %v629_v21 = vmul.f32 1.442695, %v529_v9 }
 0x18c   :  { %v413_v22 = vadd.f32 %v2716_v61, %v2774_v41  ;;  %v1225_v39 = vand.u32 2147483648, %v2821_v48  ;;  %v1223_v25 = vand.u32 2147483647, %v2821_v48  ;;  %vm1219_vm6 = vweird.f32 %v2821_v48 }
 0x18d   :  { %v526_v1 = vsub.f32 0.0, %v401_v56  ;;  %v1202_v2 = vmul.f32 %v2248_v47, %v1201_v57  ;;  %v416_v45 = vadd.f32 %v2716_v61, %v2785_v60  ;;  %vm1264_vm1 = vweird.f32 %v2842_v15 }
 0x18e   :  { %v530_v31 = vsub.f32 0.0, %v413_v22  ;;  %v1226_v34 = vor.u32 1.1754944e-38, %v1225_v39  ;;  %vm1224_vm8 = vcmp.eq.f32.partialorder %v1223_v25, 8.507059e+37  ;;  %v1270_v39 = vand.u32 2147483648, %v2842_v15 }
 0x18f   :  { %v2252_v4 = vpop.eup %2251  ;;  %v623_v5 = vmul.f32 1.442695, %v526_v1  ;;  %v1203_v6 = vadd.f32 %v2248_v47, %v1202_v2  ;;  %v531_v54 = vsub.f32 0.0, %v416_v45  ;;  %v81_v2 = vld [vmem:[%s3581_s0 + $0x1e0] sm:$0xff] }
 0x190   :  { %v2254_v8 = vpop.eup %2253  ;;  %v2838_v18 = vadd.f32 1.0, %v2252_v4  ;;  %v1788_v10 = vpop.f32.mrf.mxu1  ;;  %v631_v44 = vmul.f32 1.442695, %v530_v31  ;;  %v422_v31 = vadd.f32 %v2716_v61, %v2819_v46 }
 0x191   :  { %2257 = vpow2.f32 %v623_v5  ;;  %v1789_v12 = vadd.f32 %v2701_v27, %v1788_v10  ;;  %v1207_v13 = vsel %vm1206_vm3, %v2248_v47, %v1203_v6  ;;  %v1215_v14 = vmul.f32 %v2254_v8, %v2821_v48  ;;  %v2256_v23 = vpop.eup %2255  ;;  %v2878_v53 = vpop.f32.mrf.mxu3 }
 0x192   :  { %2259 = vrcp.f32 %v2838_v18  ;;  %v1212_v16 = vsel %vm1209_vm4, %v1211_v11, %v1207_v13  ;;  %vm1220_vm5 = vweird.f32 %v2254_v8  ;;  %v2861_v38 = vadd.f32 1.0, %v2256_v23  ;;  %2080 = vmatmul.msk.f32.gmra.mxu3 %vm91_vm0, %v81_v2 }
 0x193   :  { %1952 = vst [vmem:[#allocation2 + $0x70] sm:$0xff] %v1789_v12  ;;  %1835 = vmatmul.f32.gmra.mxu1 %v1212_v16  ;;  %v1216_v17 = vsub.f32 1.0, %v1215_v14  ;;  %2261 = vrcp.f32 %v2842_v15  ;;  %vm1221_vm7 = vmor %vm1219_vm6, %vm1220_vm5  ;;  %v1240_v47 = vand.u32 2147483648, %v2838_v18  ;;  %v1238_v49 = vand.u32 2147483647, %v2838_v18 }
 0x194   :  { %2263 = vpow2.f32 %v629_v21  ;;  %vm1234_vm10 = vweird.f32 %v2838_v18  ;;  %v633_v4 = vmul.f32 1.442695, %v531_v54  ;;  %v419_v5 = vadd.f32 %v2716_v61, %v2802_v20  ;;  %v2906_v16 = vld [vmem:[%s3585_s4] ss:$0 sm:$0xff] }
 0x195   :  { %v1217_v24 = vmul.f32 %v2254_v8, %v1216_v17  ;;  %v1241_v32 = vor.u32 1.1754944e-38, %v1240_v47  ;;  %vm1239_vm12 = vcmp.eq.f32.partialorder %v1238_v49, 8.507059e+37  ;;  %vm1279_vm6 = vweird.f32 %v2861_v38 }
 0x196   :  { %v532_v14 = vsub.f32 0.0, %v419_v5  ;;  %v533_v61 = vsub.f32 0.0, %v422_v31  ;;  %v1283_v45 = vand.u32 2147483647, %v2861_v38  ;;  %v84_v5 = vld [vmem:[%s3581_s0 + $0x1f8] sm:$0xff] }
 0x197   :  { %v2258_v26 = vpop.eup %2257  ;;  %v1218_v28 = vadd.f32 %v2254_v8, %v1217_v24  ;;  %v1268_v24 = vand.u32 2147483647, %v2842_v15 }
 0x198   :  { %v2260_v30 = vpop.eup %2259  ;;  %v2857_v41 = vadd.f32 1.0, %v2258_v26  ;;  %v1791_v33 = vpop.f32.mrf.mxu1  ;;  %v82_v26 = vld [vmem:[%s3581_s0 + $0x1e8] sm:$0xff] }
 0x199   :  { %v1792_v35 = vadd.f32 %v2701_v27, %v1791_v33  ;;  %v1222_v36 = vsel %vm1221_vm7, %v2254_v8, %v1218_v28  ;;  %v1230_v37 = vmul.f32 %v2260_v30, %v2838_v18  ;;  %v2867_v43 = vpop.eup %2261  ;;  %vm1235_vm9 = vweird.f32 %v2260_v30  ;;  %v2899_v12 = vpop.f32.mrf.mxu3 }
 0x19a   :  { %2265 = vrcp.f32 %v2857_v41  ;;  %v1227_v40 = vsel %vm1224_vm8, %v1226_v34, %v1222_v36  ;;  %v2264_v50 = vpop.eup %2263  ;;  %v1260_v52 = vmul.f32 %v2867_v43, %v2842_v15  ;;  %vm1236_vm11 = vmor %vm1234_vm10, %vm1235_vm9  ;;  %v1253_v8 = vand.u32 2147483647, %v2857_v41  ;;  %2081 = vmatmul.msk.f32.gmra.mxu3 %vm91_vm0, %v82_v26 }
 0x19b   :  { %1953 = vst [vmem:[#allocation2 + $0x78] sm:$0xff] %v1792_v35  ;;  %1838 = vmatmul.f32.vlgmr.msra.gmra.mxu2 %v1227_v40  ;;  %v1231_v42 = vsub.f32 1.0, %v1230_v37  ;;  %2267 = vrcp.f32 %v2861_v38  ;;  %v2882_v59 = vadd.f32 1.0, %v2264_v50  ;;  %vm1249_vm14 = vweird.f32 %v2857_v41 }
 0x19c   :  { %2269 = vpow2.f32 %v631_v44  ;;  %v1261_v1 = vsub.f32 1.0, %v1260_v52  ;;  %vm1265_vm2 = vweird.f32 %v2867_v43  ;;  %vm1254_vm3 = vcmp.eq.f32.partialorder %v1253_v8, 8.507059e+37  ;;  %v2962_v52 = vld [vmem:[%s3583_s2] ss:$0 sm:$0xff] }
 0x19d   :  { %v1232_v48 = vmul.f32 %v2260_v30, %v1231_v42  ;;  %2271 = vrcp.f32 %v2882_v59  ;;  %vm2923_vm4 = vmor %vm1264_vm1, %vm1265_vm2  ;;  %v1271_v34 = vor.u32 1.1754944e-38, %v1270_v39  ;;  %vm1269_vm5 = vcmp.eq.f32.partialorder %v1268_v24, 8.507059e+37 }
 0x19e   :  { %v1262_v10 = vmul.f32 %v2867_v43, %v1261_v1  ;;  %2273 = vpow2.f32 %v633_v4  ;;  %vm1284_vm9 = vcmp.eq.f32.partialorder %v1283_v45, 8.507059e+37  ;;  %vm1294_vm10 = vweird.f32 %v2882_v59 }
 0x19f   :  { %v1233_v51 = vadd.f32 %v2260_v30, %v1232_v48  ;;  %v83_v48 = vld [vmem:[%s3581_s0 + $0x1f0] sm:$0xff]  ;;  %v1300_v2 = vand.u32 2147483648, %v2882_v59  ;;  %v1298_v4 = vand.u32 2147483647, %v2882_v59  ;;  %v431_v31 = vadd.f32 %v2962_v52, %v2878_v53 }
 0x1a0   :  { %v2266_v60 = vpop.eup %2265  ;;  %v1794_v55 = vpop.f32.mrf.mxu1  ;;  %v1263_v23 = vadd.f32 %v2867_v43, %v1262_v10 }
 0x1a1   :  { %v1795_v56 = vadd.f32 %v2701_v27, %v1794_v55  ;;  %v1237_v57 = vsel %vm1236_vm11, %v2260_v30, %v1233_v51  ;;  %v1245_v58 = vmul.f32 %v2266_v60, %v2857_v41  ;;  %v2887_v3 = vpop.eup %2267  ;;  %v1255_v27 = vand.u32 2147483648, %v2857_v41  ;;  %v2937_v37 = vpop.f32.mrf.mxu3 }
 0x1a2   :  { %v1242_v63 = vsel %vm1239_vm12, %v1241_v32, %v1237_v57  ;;  %vm1250_vm13 = vweird.f32 %v2266_v60  ;;  %v2270_v18 = vpop.eup %2269  ;;  %v1275_v11 = vmul.f32 %v2887_v3, %v2861_v38  ;;  %v635_v41 = vmul.f32 1.442695, %v532_v14  ;;  %2082 = vmatmul.msk.f32.gmra.mxu3 %vm91_vm0, %v83_v48 }
 0x1a3   :  { %1954 = vst [vmem:[#allocation2 + $0x80] sm:$0xff] %v1795_v56  ;;  %1841 = vmatmul.f32.gmra.mxu2 %v1242_v63  ;;  %v1246_v0 = vsub.f32 1.0, %v1245_v58  ;;  %vm1251_vm15 = vmor %vm1249_vm14, %vm1250_vm13  ;;  %v1256_v20 = vor.u32 1.1754944e-38, %v1255_v27  ;;  %v2909_v21 = vadd.f32 1.0, %v2270_v18  ;;  %v2917_v28 = vpop.eup %2271  ;;  %v1267_v35 = vsel %vm2923_vm4, %v2867_v43, %v1263_v23 }
 0x1a4   :  { %v1276_v25 = vsub.f32 1.0, %v1275_v11  ;;  %v2274_v33 = vpop.eup %2273  ;;  %v1290_v36 = vmul.f32 %v2917_v28, %v2882_v59  ;;  %vm1280_vm7 = vweird.f32 %v2887_v3  ;;  %v1272_v62 = vsel %vm1269_vm5, %v1271_v34, %v1267_v35 }
 0x1a5   :  { %v1247_v6 = vmul.f32 %v2266_v60, %v1246_v0  ;;  %2275 = vrcp.f32 %v2909_v21  ;;  %v2942_v42 = vadd.f32 1.0, %v2274_v33  ;;  %v1285_v43 = vand.u32 2147483648, %v2861_v38  ;;  %vm2954_vm8 = vmor %vm1279_vm6, %vm1280_vm7 }
 0x1a6   :  { %v1277_v15 = vmul.f32 %v2887_v3, %v1276_v25  ;;  %2277 = vpow2.f32 %v635_v41  ;;  %v1291_v47 = vsub.f32 1.0, %v1290_v36  ;;  %v637_v51 = vmul.f32 1.442695, %v533_v61 }
 0x1a7   :  { %v1248_v9 = vadd.f32 %v2266_v60, %v1247_v6  ;;  %2279 = vrcp.f32 %v2942_v42  ;;  %v1286_v54 = vor.u32 1.1754944e-38, %v1285_v43  ;;  %vm1295_vm11 = vweird.f32 %v2917_v28 }
 0x1a8   :  { %v1797_v13 = vpop.f32.mrf.mxu1  ;;  %v1278_v44 = vadd.f32 %v2887_v3, %v1277_v15  ;;  %v1292_v32 = vmul.f32 %v2917_v28, %v1291_v47  ;;  %2281 = vpow2.f32 %v637_v51  ;;  %vm2990_vm12 = vmor %vm1294_vm10, %vm1295_vm11  ;;  %v1301_v10 = vor.u32 1.1754944e-38, %v1300_v2 }
 0x1a9   :  { %v1798_v17 = vadd.f32 %v2906_v16, %v1797_v13  ;;  %v1252_v19 = vsel %vm1251_vm15, %v2266_v60, %v1248_v9  ;;  %v425_v60 = vadd.f32 %v2962_v52, %v2836_v7  ;;  %v2973_v57 = vpop.f32.mrf.mxu3  ;;  %v428_v9 = vadd.f32 %v2962_v52, %v2855_v29 }
 0x1aa   :  { %v1257_v22 = vsel %vm1254_vm3, %v1256_v20, %v1252_v19  ;;  %v1282_v38 = vsel %vm2954_vm8, %v2887_v3, %v1278_v44  ;;  %v1293_v3 = vadd.f32 %v2917_v28, %v1292_v32  ;;  %2083 = vmatmul.msk.f32.gmra.mxu3 %vm91_vm0, %v84_v5  ;;  %vm1299_vm13 = vcmp.eq.f32.partialorder %v1298_v4, 8.507059e+37 }
 0x1ab   :  { %1955 = vst [vmem:[#allocation2 + $0x88] sm:$0xff] %v1798_v17  ;;  %1844 = vmatmul.f32.gmra.mxu2 %v1257_v22  ;;  %v2950_v49 = vpop.eup %2275  ;;  %v534_v7 = vsub.f32 0.0, %v425_v60  ;;  %v1287_v1 = vsel %vm1284_vm9, %v1286_v54, %v1282_v38  ;;  %vm1309_vm0 = vweird.f32 %v2909_v21  ;;  %v535_v29 = vsub.f32 0.0, %v428_v9 }
 0x1ac   :  { %v2278_v55 = vpop.eup %2277  ;;  %v1305_v56 = vmul.f32 %v2950_v49, %v2909_v21  ;;  %v1297_v13 = vsel %vm2990_vm12, %v2917_v28, %v1293_v3  ;;  %vm1310_vm14 = vweird.f32 %v2950_v49  ;;  %v1315_v23 = vand.u32 2147483648, %v2909_v21 }
 0x1ad   :  { %v2978_v0 = vadd.f32 1.0, %v2278_v55  ;;  %v2986_v6 = vpop.eup %2279  ;;  %v639_v18 = vmul.f32 1.442695, %v534_v7  ;;  %v1302_v39 = vsel %vm1299_vm13, %v1301_v10, %v1297_v13  ;;  %v1313_v25 = vand.u32 2147483647, %v2909_v21  ;;  %vm3016_vm15 = vmor %vm1309_vm0, %vm1310_vm14 }
 0x1ae   :  { %v1306_v27 = vsub.f32 1.0, %v1305_v56  ;;  %v2282_v11 = vpop.eup %2281  ;;  %v1320_v20 = vmul.f32 %v2986_v6, %v2942_v42  ;;  %v641_v41 = vmul.f32 1.442695, %v535_v29  ;;  %v1316_v33 = vor.u32 1.1754944e-38, %v1315_v23 }
 0x1af   :  { %2283 = vrcp.f32 %v2978_v0  ;;  %v3009_v22 = vadd.f32 1.0, %v2282_v11  ;;  %vm1314_vm1 = vcmp.eq.f32.partialorder %v1313_v25, 8.507059e+37  ;;  %vm1324_vm2 = vweird.f32 %v2942_v42 }
 0x1b0   :  { %v1800_v40 = vpop.f32.mrf.mxu1  ;;  %v1307_v59 = vmul.f32 %v2950_v49, %v1306_v27  ;;  %2285 = vpow2.f32 %v639_v18  ;;  %v1321_v26 = vsub.f32 1.0, %v1320_v20  ;;  %v536_v53 = vsub.f32 0.0, %v431_v31 }
 0x1b1   :  { %v1801_v46 = vadd.f32 %v2906_v16, %v1800_v40  ;;  %v3004_v14 = vpop.f32.mrf.mxu3  ;;  %2287 = vrcp.f32 %v3009_v22  ;;  %vm1325_vm3 = vweird.f32 %v2986_v6  ;;  %v1330_v43 = vand.u32 2147483648, %v2942_v42 }
 0x1b2   :  { %v1308_v24 = vadd.f32 %v2950_v49, %v1307_v59  ;;  %v1322_v21 = vmul.f32 %v2986_v6, %v1321_v26  ;;  %2289 = vpow2.f32 %v641_v41  ;;  %v1328_v45 = vand.u32 2147483647, %v2942_v42  ;;  %vm3045_vm4 = vmor %vm1324_vm2, %vm1325_vm3 }
 0x1b3   :  { %1956 = vst [vmem:[#allocation2 + $0x90] sm:$0xff] %v1801_v46  ;;  %1847 = vmatmul.f32.gmra.mxu2 %v1272_v62  ;;  %v643_v51 = vmul.f32 1.442695, %v536_v53  ;;  %v1331_v60 = vor.u32 1.1754944e-38, %v1330_v43  ;;  %vm1339_vm6 = vweird.f32 %v2978_v0  ;;  %v1343_v3 = vand.u32 2147483647, %v2978_v0 }
 0x1b4   :  { %v1312_v35 = vsel %vm3016_vm15, %v2950_v49, %v1308_v24  ;;  %v1323_v44 = vadd.f32 %v2986_v6, %v1322_v21  ;;  %v434_v49 = vadd.f32 %v2962_v52, %v2899_v12  ;;  %vm1329_vm5 = vcmp.eq.f32.partialorder %v1328_v45, 8.507059e+37 }
 0x1b5   :  { %v3014_v28 = vpop.eup %2283  ;;  %v1317_v62 = vsel %vm1314_vm1, %v1316_v33, %v1312_v35  ;;  %v437_v8 = vadd.f32 %v2962_v52, %v2937_v37  ;;  %vm1344_vm9 = vcmp.eq.f32.partialorder %v1343_v3, 8.507059e+37  ;;  %vm1354_vm10 = vweird.f32 %v3009_v22 }
 0x1b6   :  { %v2286_v34 = vpop.eup %2285  ;;  %v1335_v15 = vmul.f32 %v3014_v28, %v2978_v0  ;;  %v1327_v55 = vsel %vm3045_vm4, %v2986_v6, %v1323_v44  ;;  %v537_v32 = vsub.f32 0.0, %v434_v49  ;;  %vm1340_vm7 = vweird.f32 %v3014_v28 }
 0x1b7   :  { %v3034_v46 = vadd.f32 1.0, %v2286_v34  ;;  %v3039_v48 = vpop.eup %2287  ;;  %vm3068_vm8 = vmor %vm1339_vm6, %vm1340_vm7  ;;  %v538_v20 = vsub.f32 0.0, %v437_v8  ;;  %v440_v29 = vadd.f32 %v2962_v52, %v2973_v57  ;;  %v1358_v24 = vand.u32 2147483647, %v3009_v22 }
 0x1b8   :  { %v1803_v58 = vpop.f32.mrf.mxu1  ;;  %v1336_v47 = vsub.f32 1.0, %v1335_v15  ;;  %v2290_v54 = vpop.eup %2289  ;;  %v1350_v12 = vmul.f32 %v3039_v48, %v3009_v22  ;;  %v645_v5 = vmul.f32 1.442695, %v537_v32  ;;  %vm1355_vm11 = vweird.f32 %v3039_v48 }
 0x1b9   :  { %v1804_v63 = vadd.f32 %v2906_v16, %v1803_v58  ;;  %v3029_v36 = vpop.f32.mrf.mxu3  ;;  %2291 = vrcp.f32 %v3034_v46  ;;  %v3061_v7 = vadd.f32 1.0, %v2290_v54  ;;  %vm3095_vm12 = vmor %vm1354_vm10, %vm1355_vm11  ;;  %v647_v30 = vmul.f32 1.442695, %v538_v20 }
 0x1ba   :  { %v1337_v38 = vmul.f32 %v3014_v28, %v1336_v47  ;;  %2293 = vpow2.f32 %v643_v51  ;;  %v1351_v4 = vsub.f32 1.0, %v1350_v12  ;;  %v539_v57 = vsub.f32 0.0, %v440_v29 }
 0x1bb   :  { %1957 = vst [vmem:[#allocation2 + $0x98] sm:$0xff] %v1804_v63  ;;  %1850 = vmatmul.f32.gmra.mxu2 %v1287_v1  ;;  %v1332_v63 = vsel %vm1329_vm5, %v1331_v60, %v1327_v55  ;;  %v1345_v1 = vand.u32 2147483648, %v2978_v0  ;;  %2295 = vrcp.f32 %v3061_v7  ;;  %vm1359_vm13 = vcmp.eq.f32.partialorder %v1358_v24, 8.507059e+37 }
 0x1bc   :  { %v1338_v2 = vadd.f32 %v3014_v28, %v1337_v38  ;;  %v1352_v0 = vmul.f32 %v3039_v48, %v1351_v4  ;;  %2297 = vpow2.f32 %v645_v5  ;;  %vm1369_vm0 = vweird.f32 %v3034_v46 }
 0x1bd   :  { %v1346_v18 = vor.u32 1.1754944e-38, %v1345_v1  ;;  %v649_v53 = vmul.f32 1.442695, %v539_v57  ;;  %v1373_v44 = vand.u32 2147483647, %v3034_v46  ;;  %vm1384_vm2 = vweird.f32 %v3061_v7 }
 0x1be   :  { %v1342_v10 = vsel %vm3068_vm8, %v3014_v28, %v1338_v2  ;;  %v1353_v23 = vadd.f32 %v3039_v48, %v1352_v0  ;;  %v446_v5 = vadd.f32 %v2962_v52, %v3029_v36 }
 0x1bf   :  { %v3066_v27 = vpop.eup %2291  ;;  %vm1374_vm1 = vcmp.eq.f32.partialorder %v1373_v44, 8.507059e+37 }
 0x1c0   :  { %v1806_v17 = vpop.f32.mrf.mxu1  ;;  %v2294_v9 = vpop.eup %2293  ;;  %v1365_v11 = vmul.f32 %v3066_v27, %v3034_v46  ;;  %v1357_v33 = vsel %vm3095_vm12, %v3039_v48, %v1353_v23  ;;  %vm1370_vm14 = vweird.f32 %v3066_v27  ;;  %v443_v48 = vadd.f32 %v2962_v52, %v3004_v14 }
 0x1c1   :  { %v1807_v19 = vadd.f32 %v2906_v16, %v1806_v17  ;;  %v3056_v42 = vpop.f32.mrf.mxu3  ;;  %v3086_v17 = vadd.f32 1.0, %v2294_v9  ;;  %v3093_v26 = vpop.eup %2295  ;;  %vm3122_vm15 = vmor %vm1369_vm0, %vm1370_vm14  ;;  %v541_v0 = vsub.f32 0.0, %v446_v5 }
 0x1c2   :  { %v1366_v25 = vsub.f32 1.0, %v1365_v11  ;;  %v2298_v41 = vpop.eup %2297  ;;  %v1380_v34 = vmul.f32 %v3093_v26, %v3061_v7  ;;  %v540_v55 = vsub.f32 0.0, %v443_v48  ;;  %vm1385_vm3 = vweird.f32 %v3093_v26 }
 0x1c3   :  { %1958 = vst [vmem:[#allocation2 + $0xa0] sm:$0xff] %v1807_v19  ;;  %1853 = vmatmul.f32.gmra.mxu2 %v1302_v39  ;;  %v1347_v19 = vsel %vm1344_vm9, %v1346_v18, %v1342_v10  ;;  %v1360_v39 = vand.u32 2147483648, %v3009_v22  ;;  %2299 = vrcp.f32 %v3086_v17  ;;  %v3109_v15 = vadd.f32 1.0, %v2298_v41  ;;  %vm3147_vm4 = vmor %vm1384_vm2, %vm1385_vm3 }
 0x1c4   :  { %v1367_v22 = vmul.f32 %v3066_v27, %v1366_v25  ;;  %2301 = vpow2.f32 %v647_v30  ;;  %v1381_v45 = vsub.f32 1.0, %v1380_v34  ;;  %vm1399_vm6 = vweird.f32 %v3086_v17 }
 0x1c5   :  { %v1361_v31 = vor.u32 1.1754944e-38, %v1360_v39  ;;  %2303 = vrcp.f32 %v3109_v15  ;;  %v653_v24 = vmul.f32 1.442695, %v541_v0  ;;  %vm1414_vm10 = vweird.f32 %v3109_v15 }
 0x1c6   :  { %v1368_v43 = vadd.f32 %v3066_v27, %v1367_v22  ;;  %2305 = vpow2.f32 %v649_v53  ;;  %v1382_v54 = vmul.f32 %v3093_v26, %v1381_v45  ;;  %v1420_v53 = vand.u32 2147483648, %v3109_v15 }
 0x1c8   :  { %v1809_v40 = vpop.f32.mrf.mxu1  ;;  %v1372_v60 = vsel %vm3122_vm15, %v3066_v27, %v1368_v43  ;;  %v1383_v2 = vadd.f32 %v3093_v26, %v1382_v54  ;;  %v651_v27 = vmul.f32 1.442695, %v540_v55 }
 0x1c9   :  { %v1810_v61 = vadd.f32 %v2906_v16, %v1809_v40  ;;  %v3081_v13 = vpop.f32.mrf.mxu3  ;;  %v3116_v47 = vpop.eup %2299 }
 0x1ca   :  { %v2302_v51 = vpop.eup %2301  ;;  %v1395_v14 = vmul.f32 %v3116_v47, %v3086_v17  ;;  %v1387_v18 = vsel %vm3147_vm4, %v3093_v26, %v1383_v2  ;;  %vm1400_vm7 = vweird.f32 %v3116_v47  ;;  %v449_v26 = vadd.f32 %v2962_v52, %v3056_v42 }
 0x1cb   :  { %1959 = vst [vmem:[#allocation2 + $0xa8] sm:$0xff] %v1810_v61  ;;  %1856 = vmatmul.f32.gmra.mxu2 %v1317_v62  ;;  %v1362_v61 = vsel %vm1359_vm13, %v1361_v31, %v1357_v33  ;;  %v1375_v62 = vand.u32 2147483648, %v3034_v46  ;;  %v3138_v32 = vadd.f32 1.0, %v2302_v51  ;;  %v3142_v1 = vpop.eup %2303  ;;  %vm3171_vm8 = vmor %vm1399_vm6, %vm1400_vm7  ;;  %v452_v48 = vadd.f32 %v2962_v52, %v3081_v13 }
 0x1cc   :  { %v1396_v3 = vsub.f32 1.0, %v1395_v14  ;;  %v2306_v4 = vpop.eup %2305  ;;  %v1410_v10 = vmul.f32 %v3142_v1, %v3109_v15  ;;  %v542_v34 = vsub.f32 0.0, %v449_v26  ;;  %vm1415_vm11 = vweird.f32 %v3142_v1 }
 0x1cd   :  { %v1376_v50 = vor.u32 1.1754944e-38, %v1375_v62  ;;  %2307 = vrcp.f32 %v3138_v32  ;;  %v3152_v8 = vadd.f32 1.0, %v2306_v4  ;;  %v1418_v62 = vand.u32 2147483647, %v3109_v15  ;;  %vm3195_vm12 = vmor %vm1414_vm10, %vm1415_vm11 }
 0x1ce   :  { %v1397_v9 = vmul.f32 %v3116_v47, %v1396_v3  ;;  %2309 = vpow2.f32 %v651_v27  ;;  %v1411_v39 = vsub.f32 1.0, %v1410_v10  ;;  %vm1429_vm0 = vweird.f32 %v3138_v32 }
 0x1cf   :  { %2311 = vrcp.f32 %v3152_v8  ;;  %vm1419_vm13 = vcmp.eq.f32.partialorder %v1418_v62, 8.507059e+37  ;;  %v543_v13 = vsub.f32 0.0, %v452_v48  ;;  %vm1444_vm2 = vweird.f32 %v3152_v8 }
 0x1d0   :  { %v1812_v56 = vpop.f32.mrf.mxu1  ;;  %v1398_v29 = vadd.f32 %v3116_v47, %v1397_v9  ;;  %2313 = vpow2.f32 %v653_v24 }
 0x1d1   :  { %v1813_v58 = vadd.f32 %v2906_v16, %v1812_v56  ;;  %v3106_v35 = vpop.f32.mrf.mxu3  ;;  %v1377_v56 = vsel %vm1374_vm1, %v1376_v50, %v1372_v60  ;;  %v1421_v50 = vor.u32 1.1754944e-38, %v1420_v53  ;;  %v657_v4 = vmul.f32 1.442695, %v543_v13 }
 0x1d2   :  { %v1402_v41 = vsel %vm3171_vm8, %v3116_v47, %v1398_v29  ;;  %v655_v47 = vmul.f32 1.442695, %v542_v34  ;;  %v455_v2 = vadd.f32 %v2962_v52, %v3106_v35  ;;  %v1448_v29 = vand.u32 2147483647, %v3152_v8 }
 0x1d3   :  { %1960 = vst [vmem:[#allocation2 + $0xb0] sm:$0xff] %v1813_v58  ;;  %1859 = vmatmul.f32.gmra.mxu2 %v1332_v63  ;;  %v1388_v58 = vand.u32 2147483647, %v3061_v7  ;;  %v1390_v63 = vand.u32 2147483648, %v3061_v7  ;;  %v3169_v23 = vpop.eup %2307 }
 0x1d4   :  { %v2310_v28 = vpop.eup %2309  ;;  %v1425_v57 = vmul.f32 %v3169_v23, %v3138_v32  ;;  %vm1430_vm14 = vweird.f32 %v3169_v23 }
 0x1d5   :  { %vm1389_vm5 = vcmp.eq.f32.partialorder %v1388_v58, 8.507059e+37  ;;  %v1391_v7 = vor.u32 1.1754944e-38, %v1390_v63  ;;  %v3186_v22 = vpop.eup %2311  ;;  %v3188_v42 = vadd.f32 1.0, %v2310_v28  ;;  %vm3224_vm15 = vmor %vm1429_vm0, %vm1430_vm14 }
 0x1d6   :  { %v1426_v43 = vsub.f32 1.0, %v1425_v57  ;;  %v1440_v45 = vmul.f32 %v3186_v22, %v3152_v8  ;;  %v2314_v49 = vpop.eup %2313  ;;  %vm1445_vm3 = vweird.f32 %v3186_v22 }
 0x1d7   :  { %v1392_v20 = vsel %vm1389_vm5, %v1391_v7, %v1387_v18  ;;  %2315 = vrcp.f32 %v3188_v42  ;;  %v3212_v55 = vadd.f32 1.0, %v2314_v49  ;;  %v544_v18 = vsub.f32 0.0, %v455_v2  ;;  %vm3244_vm4 = vmor %vm1444_vm2, %vm1445_vm3 }
 0x1d8   :  { %v1815_v59 = vpop.f32.mrf.mxu1  ;;  %v1427_v51 = vmul.f32 %v3169_v23, %v1426_v43  ;;  %v1441_v14 = vsub.f32 1.0, %v1440_v45  ;;  %2317 = vpow2.f32 %v655_v47  ;;  %vm1449_vm5 = vcmp.eq.f32.partialorder %v1448_v29, 8.507059e+37 }
 0x1d9   :  { %v1816_v37 = vadd.f32 %v2906_v16, %v1815_v59  ;;  %v3133_v46 = vpop.f32.mrf.mxu3  ;;  %2319 = vrcp.f32 %v3212_v55  ;;  %v659_v24 = vmul.f32 1.442695, %v544_v18  ;;  %vm1459_vm6 = vweird.f32 %v3188_v42 }
 0x1da   :  { %v1428_v63 = vadd.f32 %v3169_v23, %v1427_v51  ;;  %v1442_v27 = vmul.f32 %v3186_v22, %v1441_v14  ;;  %2321 = vpow2.f32 %v657_v4  ;;  %v1463_v43 = vand.u32 2147483647, %v3188_v42 }
 0x1db   :  { %1961 = vst [vmem:[#allocation2 + $0xb8] sm:$0xff] %v1816_v37  ;;  %1862 = vmatmul.f32.gmra.mxu2 %v1347_v19  ;;  %v1405_v37 = vand.u32 2147483648, %v3086_v17  ;;  %v1403_v19 = vand.u32 2147483647, %v3086_v17  ;;  %v1412_v17 = vmul.f32 %v3142_v1, %v1411_v39  ;;  %vm1474_vm10 = vweird.f32 %v3212_v55 }
 0x1dc   :  { %v1432_v35 = vsel %vm3224_vm15, %v3169_v23, %v1428_v63  ;;  %v1443_v0 = vadd.f32 %v3186_v22, %v1442_v27  ;;  %v458_v23 = vadd.f32 %v2962_v52, %v3133_v46  ;;  %v1478_v14 = vand.u32 2147483647, %v3212_v55 }
 0x1dd   :  { %v1406_v30 = vor.u32 1.1754944e-38, %v1405_v37  ;;  %vm1404_vm9 = vcmp.eq.f32.partialorder %v1403_v19, 8.507059e+37  ;;  %v3216_v58 = vpop.eup %2315  ;;  %v1480_v13 = vand.u32 2147483648, %v3212_v55 }
 0x1de   :  { %v1455_v6 = vmul.f32 %v3216_v58, %v3188_v42  ;;  %v2318_v7 = vpop.eup %2317  ;;  %v1447_v25 = vsel %vm3244_vm4, %v3186_v22, %v1443_v0  ;;  %vm1460_vm7 = vweird.f32 %v3216_v58 }
 0x1df   :  { %v3249_v39 = vpop.eup %2319  ;;  %vm3271_vm8 = vmor %vm1459_vm6, %vm1460_vm7  ;;  %v1481_v3 = vor.u32 1.1754944e-38, %v1480_v13 }
 0x1e0   :  { %v1818_v21 = vpop.f32.mrf.mxu1  ;;  %v1456_v19 = vsub.f32 1.0, %v1455_v6  ;;  %vm1475_vm11 = vweird.f32 %v3249_v39 }
 0x1e1   :  { %v1819_v40 = vadd.f32 %v2906_v16, %v1818_v21  ;;  %v3160_v36 = vpop.f32.mrf.mxu3 }
 0x1e2   :  { %v1457_v28 = vmul.f32 %v3216_v58, %v1456_v19 }
 0x1e3   :  { %1962 = vst [vmem:[#allocation2 + $0xc0] sm:$0xff] %v1819_v40  ;;  %1865 = vmatmul.f32.gmra.mxu2 %v1362_v61  ;;  %v1407_v40 = vsel %vm1404_vm9, %v1406_v30, %v1402_v41  ;;  %v1413_v61 = vadd.f32 %v3142_v1, %v1412_v17  ;;  %v2322_v30 = vpop.eup %2321  ;;  %v545_v41 = vsub.f32 0.0, %v458_v23  ;;  %vm1464_vm9 = vcmp.eq.f32.partialorder %v1463_v43, 8.507059e+37 }
 0x1e4   :  { %v3265_v22 = vadd.f32 1.0, %v2322_v30  ;;  %v1458_v34 = vadd.f32 %v3216_v58, %v1457_v28 }
 0x1e5   :  { %v1417_v15 = vsel %vm3195_vm12, %v3142_v1, %v1413_v61  ;;  %v1433_v1 = vand.u32 2147483647, %v3138_v32  ;;  %v661_v53 = vmul.f32 1.442695, %v545_v41  ;;  %v461_v61 = vadd.f32 %v2962_v52, %v3160_v36  ;;  %vm3294_vm12 = vmor %vm1474_vm10, %vm1475_vm11 }
 0x1e6   :  { %v1462_v47 = vsel %vm3271_vm8, %v3216_v58, %v1458_v34  ;;  %vm1504_vm2 = vweird.f32 %v3265_v22 }
 0x1e7   :  { %vm1434_vm1 = vcmp.eq.f32.partialorder %v1433_v1, 8.507059e+37  ;;  %v546_v49 = vsub.f32 0.0, %v461_v61 }
 0x1e8   :  { %v1821_v38 = vpop.f32.mrf.mxu1 }
 0x1e9   :  { %v1822_v12 = vadd.f32 %v2906_v16, %v1821_v38  ;;  %v3183_v31 = vpop.f32.mrf.mxu3 }
 0x1ea   :  { %v464_v63 = vadd.f32 %v2962_v52, %v3183_v31 }
 0x1eb   :  { %1963 = vst [vmem:[#allocation2 + $0xc8] sm:$0xff] %v1822_v12  ;;  %1868 = vmatmul.f32.gmra.mxu2 %v1377_v56  ;;  %v1422_v12 = vsel %vm1419_vm13, %v1421_v50, %v1417_v15  ;;  %v1435_v56 = vand.u32 2147483648, %v3138_v32  ;;  %vm1479_vm13 = vcmp.eq.f32.partialorder %v1478_v14, 8.507059e+37 }
 0x1ed   :  { %v1436_v5 = vor.u32 1.1754944e-38, %v1435_v56 }
 0x1f0   :  { %v1824_v11 = vpop.f32.mrf.mxu1 }
 0x1f1   :  { %v1825_v59 = vadd.f32 %v2906_v16, %v1824_v11  ;;  %v3208_v60 = vpop.f32.mrf.mxu3  ;;  %v1450_v11 = vand.u32 2147483648, %v3152_v8  ;;  %v1470_v8 = vmul.f32 %v3249_v39, %v3212_v55 }
 0x1f3   :  { %1964 = vst [vmem:[#allocation2 + $0xd0] sm:$0xff] %v1825_v59  ;;  %1871 = vmatmul.f32.gmra.mxu2 %v1392_v20  ;;  %v3242_v59 = vadd.f32 1.0, %v2318_v7  ;;  %v1437_v20 = vsel %vm1434_vm1, %v1436_v5, %v1432_v35  ;;  %v1451_v26 = vor.u32 1.1754944e-38, %v1450_v11  ;;  %v547_v7 = vsub.f32 0.0, %v464_v63 }
 0x1f4   :  { %v467_v35 = vadd.f32 %v2962_v52, %v3208_v60 }
 0x1f5   :  { %2323 = vrcp.f32 %v3242_v59  ;;  %vm1489_vm0 = vweird.f32 %v3242_v59  ;;  %v1493_v11 = vand.u32 2147483647, %v3242_v59  ;;  %v665_v37 = vmul.f32 1.442695, %v547_v7 }
 0x1f6   :  { %2325 = vpow2.f32 %v659_v24  ;;  %v548_v19 = vsub.f32 0.0, %v467_v35 }
 0x1f7   :  { %2327 = vrcp.f32 %v3265_v22  ;;  %vm1494_vm1 = vcmp.eq.f32.partialorder %v1493_v11, 8.507059e+37 }
 0x1f8   :  { %v1827_v33 = vpop.f32.mrf.mxu1  ;;  %2329 = vpow2.f32 %v661_v53  ;;  %v667_v30 = vmul.f32 1.442695, %v548_v19 }
 0x1f9   :  { %v1828_v21 = vadd.f32 %v2906_v16, %v1827_v33  ;;  %v3237_v32 = vpop.f32.mrf.mxu3  ;;  %v1452_v33 = vsel %vm1449_vm5, %v1451_v26, %v1447_v25 }
 0x1fa   :  { %v470_v34 = vadd.f32 %v2962_v52, %v3237_v32 }
 0x1fb   :  { %1965 = vst [vmem:[#allocation2 + $0xd8] sm:$0xff] %v1828_v21  ;;  %1874 = vmatmul.f32.gmra.mxu2 %v1407_v40  ;;  %v1465_v21 = vand.u32 2147483648, %v3188_v42  ;;  %v1471_v40 = vsub.f32 1.0, %v1470_v8  ;;  %v3276_v44 = vpop.eup %2323 }
 0x1fc   :  { %v2326_v45 = vpop.eup %2325  ;;  %v1485_v50 = vmul.f32 %v3276_v44, %v3242_v59  ;;  %vm1490_vm14 = vweird.f32 %v3276_v44 }
 0x1fd   :  { %v1466_v48 = vor.u32 1.1754944e-38, %v1465_v21  ;;  %v1472_v36 = vmul.f32 %v3249_v39, %v1471_v40  ;;  %v3289_v42 = vadd.f32 1.0, %v2326_v45  ;;  %v3298_v58 = vpop.eup %2327  ;;  %vm3324_vm15 = vmor %vm1489_vm0, %vm1490_vm14  ;;  %v1508_v40 = vand.u32 2147483647, %v3265_v22 }
 0x1fe   :  { %v1486_v56 = vsub.f32 1.0, %v1485_v50  ;;  %v2330_v1 = vpop.eup %2329  ;;  %v1500_v5 = vmul.f32 %v3298_v58, %v3265_v22  ;;  %vm1505_vm3 = vweird.f32 %v3298_v58  ;;  %v549_v45 = vsub.f32 0.0, %v470_v34 }
 0x1ff   :  { %v1467_v51 = vsel %vm1464_vm9, %v1466_v48, %v1462_v47  ;;  %2331 = vrcp.f32 %v3289_v42  ;;  %v3312_v31 = vadd.f32 1.0, %v2330_v1  ;;  %vm3349_vm4 = vmor %vm1504_vm2, %vm1505_vm3  ;;  %vm1509_vm5 = vcmp.eq.f32.partialorder %v1508_v40, 8.507059e+37 }
 0x200   :  { %v1830_v54 = vpop.f32.mrf.mxu1  ;;  %v1487_v27 = vmul.f32 %v3276_v44, %v1486_v56  ;;  %vm1519_vm6 = vweird.f32 %v3289_v42  ;;  %v1523_v13 = vand.u32 2147483647, %v3289_v42 }
 0x201   :  { %v1831_v38 = vadd.f32 %v2906_v16, %v1830_v54  ;;  %v3260_v17 = vpop.f32.mrf.mxu3  ;;  %v1473_v54 = vadd.f32 %v3249_v39, %v1472_v36  ;;  %vm1534_vm10 = vweird.f32 %v3312_v31 }
 0x202   :  { %v1488_v0 = vadd.f32 %v3276_v44, %v1487_v27  ;;  %vm1524_vm9 = vcmp.eq.f32.partialorder %v1523_v13, 8.507059e+37 }
 0x203   :  { %1966 = vst [vmem:[#allocation2 + $0xe0] sm:$0xff] %v1831_v38  ;;  %1877 = vmatmul.f32.gmra.mxu2 %v1422_v12  ;;  %v663_v38 = vmul.f32 1.442695, %v546_v49  ;;  %v1477_v55 = vsel %vm3294_vm12, %v3249_v39, %v1473_v54  ;;  %v1525_v49 = vand.u32 2147483648, %v3289_v42  ;;  %v669_v12 = vmul.f32 1.442695, %v549_v45 }
 0x204   :  { %v1482_v18 = vsel %vm1479_vm13, %v1481_v3, %v1477_v55 }
 0x205   :  { %2333 = vpow2.f32 %v663_v38  ;;  %v1526_v63 = vor.u32 1.1754944e-38, %v1525_v49 }
 0x206   :  { %2335 = vrcp.f32 %v3312_v31 }
 0x207   :  { %2337 = vpow2.f32 %v665_v37 }
 0x208   :  { %v1833_v9 = vpop.f32.mrf.mxu1 }
 0x209   :  { %v1834_v10 = vadd.f32 %v2906_v16, %v1833_v9  ;;  %v3285_v15 = vpop.f32.mrf.mxu3  ;;  %v1495_v9 = vand.u32 2147483648, %v3242_v59  ;;  %v1492_v59 = vsel %vm3324_vm15, %v3276_v44, %v1488_v0 }
 0x20a   :  { %v476_v19 = vadd.f32 %v2962_v52, %v3285_v15 }
 0x20b   :  { %1967 = vst [vmem:[#allocation2 + $0xe8] sm:$0xff] %v1834_v10  ;;  %1880 = vmatmul.f32.gmra.mxu2 %v1437_v20  ;;  %v3319_v10 = vpop.eup %2331  ;;  %v1501_v20 = vsub.f32 1.0, %v1500_v5  ;;  %v1496_v23 = vor.u32 1.1754944e-38, %v1495_v9 }
 0x20c   :  { %v2334_v29 = vpop.eup %2333  ;;  %v1515_v24 = vmul.f32 %v3319_v10, %v3289_v42  ;;  %vm1520_vm7 = vweird.f32 %v3319_v10 }
 0x20d   :  { %v1502_v26 = vmul.f32 %v3298_v58, %v1501_v20  ;;  %v3337_v8 = vadd.f32 1.0, %v2334_v29  ;;  %v3341_v41 = vpop.eup %2335  ;;  %vm3371_vm8 = vmor %vm1519_vm6, %vm1520_vm7 }
 0x20e   :  { %v1530_v61 = vmul.f32 %v3341_v41, %v3312_v31  ;;  %v2338_v62 = vpop.eup %2337  ;;  %vm1535_vm11 = vweird.f32 %v3341_v41 }
 0x20f   :  { %v1503_v21 = vadd.f32 %v3298_v58, %v1502_v26  ;;  %2339 = vrcp.f32 %v3337_v8  ;;  %v3364_v36 = vadd.f32 1.0, %v2338_v62  ;;  %vm3393_vm12 = vmor %vm1534_vm10, %vm1535_vm11  ;;  %vm1549_vm0 = vweird.f32 %v3337_v8 }
 0x210   :  { %v1836_v46 = vpop.f32.mrf.mxu1  ;;  %2341 = vpow2.f32 %v667_v30  ;;  %v1531_v50 = vsub.f32 1.0, %v1530_v61  ;;  %v1555_v34 = vand.u32 2147483648, %v3337_v8  ;;  %v1553_v53 = vand.u32 2147483647, %v3337_v8 }
 0x211   :  { %v1837_v57 = vadd.f32 %v2906_v16, %v1836_v46  ;;  %v3310_v6 = vpop.f32.mrf.mxu3  ;;  %v1497_v46 = vsel %vm1494_vm1, %v1496_v23, %v1492_v59  ;;  %2343 = vrcp.f32 %v3364_v36  ;;  %vm1564_vm2 = vweird.f32 %v3364_v36 }
 0x212   :  { %v1532_v1 = vmul.f32 %v3341_v41, %v1531_v50  ;;  %2345 = vpow2.f32 %v669_v12  ;;  %v1556_v49 = vor.u32 1.1754944e-38, %v1555_v34  ;;  %vm1554_vm1 = vcmp.eq.f32.partialorder %v1553_v53, 8.507059e+37 }
 0x213   :  { %1968 = vst [vmem:[#allocation2 + $0xf0] sm:$0xff] %v1837_v57  ;;  %1883 = vmatmul.f32.gmra.mxu2 %v1452_v33  ;;  %v1510_v57 = vand.u32 2147483648, %v3265_v22  ;;  %v1516_v33 = vsub.f32 1.0, %v1515_v24  ;;  %v1507_v22 = vsel %vm3349_vm4, %v3298_v58, %v1503_v21  ;;  %v473_v58 = vadd.f32 %v2962_v52, %v3260_v17 }
 0x214   :  { %v1533_v35 = vadd.f32 %v3341_v41, %v1532_v1 }
 0x215   :  { %v1511_v44 = vor.u32 1.1754944e-38, %v1510_v57  ;;  %v1517_v32 = vmul.f32 %v3319_v10, %v1516_v33  ;;  %v550_v5 = vsub.f32 0.0, %v473_v58 }
 0x217   :  { %v1512_v54 = vsel %vm1509_vm5, %v1511_v44, %v1507_v22  ;;  %v1518_v14 = vadd.f32 %v3319_v10, %v1517_v32  ;;  %v671_v29 = vmul.f32 1.442695, %v550_v5 }
 0x219   :  { %v3335_v28 = vpop.f32.mrf.mxu3  ;;  %v1522_v42 = vsel %vm3371_vm8, %v3319_v10, %v1518_v14  ;;  %v1538_v10 = vand.u32 2147483647, %v3312_v31 }
 0x21a   :  { %v1527_v7 = vsel %vm1524_vm9, %v1526_v63, %v1522_v42  ;;  %v1568_v63 = vand.u32 2147483647, %v3364_v36 }
 0x21b   :  { %1886 = vmatmul.f32.gmra.mxu2 %v1467_v51  ;;  %v3367_v51 = vpop.eup %2339  ;;  %vm1539_vm13 = vcmp.eq.f32.partialorder %v1538_v10, 8.507059e+37 }
 0x21c   :  { %v2342_v38 = vpop.eup %2341  ;;  %v1545_v3 = vmul.f32 %v3367_v51, %v3337_v8  ;;  %vm1550_vm14 = vweird.f32 %v3367_v51  ;;  %vm1569_vm7 = vcmp.eq.f32.partialorder %v1568_v63, 8.507059e+37 }
 0x21d   :  { %v3398_v20 = vpop.eup %2343  ;;  %vm3418_vm15 = vmor %vm1549_vm0, %vm1550_vm14 }
 0x21e   :  { %v1839_v2 = vpop.f32.mrf.mxu2  ;;  %v1546_v0 = vsub.f32 1.0, %v1545_v3  ;;  %v2346_v60 = vpop.eup %2345  ;;  %vm1565_vm3 = vweird.f32 %v3398_v20 }
 0x21f   :  { %v1840_v4 = vadd.f32 %v2906_v16, %v1839_v2  ;;  %v3379_v2 = vadd.f32 1.0, %v2342_v38  ;;  %vm3450_vm4 = vmor %vm1564_vm2, %vm1565_vm3 }
 0x221   :  { %1969 = vst [vmem:[#allocation2 + $0xf8] sm:$0xff] %v1840_v4  ;;  %v3360_v48 = vpop.f32.mrf.mxu3  ;;  %2347 = vrcp.f32 %v3379_v2  ;;  %vm1579_vm5 = vweird.f32 %v3379_v2  ;;  %v1585_v10 = vand.u32 2147483648, %v3379_v2 }
 0x223   :  { %1889 = vmatmul.f32.gmra.mxu2 %v1482_v18  ;;  %v1540_v18 = vand.u32 2147483648, %v3312_v31  ;;  %v1547_v31 = vmul.f32 %v3367_v51, %v1546_v0 }
 0x225   :  { %v1541_v23 = vor.u32 1.1754944e-38, %v1540_v18  ;;  %v1548_v33 = vadd.f32 %v3367_v51, %v1547_v31 }
 0x226   :  { %v1842_v39 = vpop.f32.mrf.mxu2 }
 0x227   :  { %v1843_v25 = vadd.f32 %v2906_v16, %v1842_v39  ;;  %v1537_v39 = vsel %vm3393_vm12, %v3341_v41, %v1533_v35  ;;  %v3409_v30 = vpop.eup %2347  ;;  %v551_v41 = vsub.f32 0.0, %v476_v19  ;;  %v1552_v22 = vsel %vm3418_vm15, %v3367_v51, %v1548_v33 }
 0x228   :  { %v1542_v57 = vsel %vm1539_vm13, %v1541_v23, %v1537_v39  ;;  %v1575_v61 = vmul.f32 %v3409_v30, %v3379_v2  ;;  %v1570_v51 = vand.u32 2147483648, %v3364_v36  ;;  %v1557_v56 = vsel %vm1554_vm1, %v1556_v49, %v1552_v22 }
 0x229   :  { %1970 = vst [vmem:[#allocation2 + $0x100] sm:$0xff] %v1843_v25  ;;  %v487_v17 = vpop.f32.mrf.mxu3  ;;  %v1560_v25 = vmul.f32 %v3398_v20, %v3364_v36  ;;  %v673_v32 = vmul.f32 1.442695, %v551_v41  ;;  %vm1580_vm6 = vweird.f32 %v3409_v30  ;;  %v1583_v23 = vand.u32 2147483647, %v3379_v2 }
 0x22a   :  { %v488_v27 = vadd.f32 %v2962_v52, %v487_v17  ;;  %v1576_v14 = vsub.f32 1.0, %v1575_v61  ;;  %vm3474_vm8 = vmor %vm1579_vm5, %vm1580_vm6 }
 0x22b   :  { %1892 = vmatmul.f32.gmra.mxu2 %v1497_v46  ;;  %v3411_v46 = vadd.f32 1.0, %v2346_v60  ;;  %vm1584_vm13 = vcmp.eq.f32.partialorder %v1583_v23, 8.507059e+37 }
 0x22c   :  { %v555_v11 = vsub.f32 0.0, %v488_v27  ;;  %v482_v27 = vadd.f32 %v2962_v52, %v3335_v28 }
 0x22d   :  { %vm1594_vm0 = vweird.f32 %v3411_v46  ;;  %v1598_v22 = vand.u32 2147483647, %v3411_v46 }
 0x22e   :  { %v1845_v43 = vpop.f32.mrf.mxu2  ;;  %v681_v37 = vmul.f32 1.442695, %v555_v11 }
 0x22f   :  { %v1846_v47 = vadd.f32 %v2906_v16, %v1845_v43  ;;  %v479_v43 = vadd.f32 %v2962_v52, %v3310_v6 }
 0x230   :  { %2349 = vpow2.f32 %v681_v37 }
 0x231   :  { %1971 = vst [vmem:[#allocation2 + $0x108] sm:$0xff] %v1846_v47  ;;  %v490_v26 = vpop.f32.mrf.mxu3  ;;  %2351 = vpow2.f32 %v671_v29  ;;  %v552_v13 = vsub.f32 0.0, %v479_v43 }
 0x232   :  { %v491_v15 = vadd.f32 %v2962_v52, %v490_v26  ;;  %2353 = vrcp.f32 %v3411_v46 }
 0x233   :  { %1895 = vmatmul.f32.gmra.mxu2 %v1512_v54  ;;  %v3437_v54 = vld [vmem:[%s3585_s4] ss:$0 sm:$0xff]  ;;  %v675_v3 = vmul.f32 1.442695, %v552_v13 }
 0x234   :  { %v556_v21 = vsub.f32 0.0, %v491_v15 }
 0x236   :  { %v1848_v55 = vpop.f32.mrf.mxu2  ;;  %v2350_v62 = vpop.eup %2349  ;;  %v683_v44 = vmul.f32 1.442695, %v556_v21 }
 0x237   :  { %v1849_v4 = vadd.f32 %v2906_v16, %v1848_v55  ;;  %v3428_v45 = vadd.f32 1.0, %v2350_v62  ;;  %v2352_v50 = vpop.eup %2351  ;;  %v1577_v55 = vmul.f32 %v3409_v30, %v1576_v14 }
 0x238   :  { %2355 = vpow2.f32 %v683_v44  ;;  %v3444_v38 = vpop.eup %2353  ;;  %v3446_v12 = vadd.f32 1.0, %v2352_v50 }
 0x239   :  { %1972 = vst [vmem:[#allocation2 + $0x110] sm:$0xff] %v1849_v4  ;;  %2357 = vrcp.f32 %v3428_v45  ;;  %v1571_v4 = vor.u32 1.1754944e-38, %v1570_v51  ;;  %v1590_v36 = vmul.f32 %v3444_v38, %v3411_v46  ;;  %v1578_v28 = vadd.f32 %v3409_v30, %v1577_v55 }
 0x23a   :  { %2359 = vpow2.f32 %v673_v32  ;;  %v1690_v31 = vand.u32 2147483648, %v3428_v45  ;;  %vm1684_vm9 = vweird.f32 %v3428_v45  ;;  %v1688_v26 = vand.u32 2147483647, %v3428_v45 }
 0x23b   :  { %1898 = vmatmul.f32.gmra.mxu2 %v1527_v7  ;;  %2361 = vrcp.f32 %v3446_v12  ;;  %v1591_v37 = vsub.f32 1.0, %v1590_v36  ;;  %v1582_v39 = vsel %vm3474_vm8, %v3409_v30, %v1578_v28  ;;  %vm1595_vm14 = vweird.f32 %v3444_v38 }
 0x23c   :  { %v1691_v33 = vor.u32 1.1754944e-38, %v1690_v31  ;;  %vm1689_vm12 = vcmp.eq.f32.partialorder %v1688_v26, 8.507059e+37  ;;  %v1600_v32 = vand.u32 2147483648, %v3411_v46  ;;  %vm3506_vm15 = vmor %vm1594_vm0, %vm1595_vm14  ;;  %vm1609_vm6 = vweird.f32 %v3446_v12 }
 0x23d   :  { %v1592_v2 = vmul.f32 %v3444_v38, %v1591_v37  ;;  %v1615_v36 = vand.u32 2147483648, %v3446_v12 }
 0x23e   :  { %v1851_v24 = vpop.f32.mrf.mxu2  ;;  %v2356_v42 = vpop.eup %2355 }
 0x23f   :  { %v1852_v59 = vadd.f32 %v2906_v16, %v1851_v24  ;;  %v1561_v16 = vsub.f32 1.0, %v1560_v25  ;;  %v2358_v17 = vpop.eup %2357  ;;  %v3459_v5 = vadd.f32 1.0, %v2356_v42  ;;  %v1586_v24 = vor.u32 1.1754944e-38, %v1585_v10 }
 0x240   :  { %v1680_v18 = vmul.f32 %v2358_v17, %v3428_v45  ;;  %v2360_v9 = vpop.eup %2359  ;;  %vm1685_vm10 = vweird.f32 %v2358_v17  ;;  %v1616_v28 = vor.u32 1.1754944e-38, %v1615_v36 }
 0x241   :  { %1973 = vst [vmem:[#allocation2 + $0x118] sm:$0xff] %v1852_v59  ;;  %v1562_v8 = vmul.f32 %v3398_v20, %v1561_v16  ;;  %2363 = vrcp.f32 %v3459_v5  ;;  %v3478_v60 = vadd.f32 1.0, %v2360_v9  ;;  %v3485_v25 = vpop.eup %2361  ;;  %vm1686_vm11 = vmor %vm1684_vm9, %vm1685_vm10  ;;  %v1587_v45 = vsel %vm1584_vm13, %v1586_v24, %v1582_v39 }
 0x242   :  { %2365 = vpow2.f32 %v675_v3  ;;  %v1681_v11 = vsub.f32 1.0, %v1680_v18  ;;  %v1605_v61 = vmul.f32 %v3485_v25, %v3446_v12  ;;  %vm1699_vm1 = vweird.f32 %v3459_v5 }
 0x243   :  { %1901 = vmatmul.f32.gmra.mxu2 %v1542_v57  ;;  %v1563_v58 = vadd.f32 %v3398_v20, %v1562_v8  ;;  %v2383_v57 = vld [vmem:[%s3583_s2] ss:$0 sm:$0xff]  ;;  %2367 = vrcp.f32 %v3478_v60  ;;  %v1703_v51 = vand.u32 2147483647, %v3459_v5  ;;  %v1613_v18 = vand.u32 2147483647, %v3446_v12 }
 0x244   :  { %v1682_v19 = vmul.f32 %v2358_v17, %v1681_v11  ;;  %v485_v30 = vadd.f32 %v2383_v57, %v3360_v48  ;;  %v1606_v50 = vsub.f32 1.0, %v1605_v61  ;;  %vm1624_vm10 = vweird.f32 %v3478_v60  ;;  %s2410_s2 = smov [#allocation2]  }
 0x245   :  { %v1567_v35 = vsel %vm3450_vm4, %v3398_v20, %v1563_v58  ;;  %v553_v20 = vsub.f32 0.0, %v482_v27  ;;  %vm1599_vm4 = vcmp.eq.f32.partialorder %v1598_v22, 8.507059e+37  ;;  %vm1704_vm5 = vcmp.eq.f32.partialorder %v1703_v51, 8.507059e+37  ;;  %s2006_s8 = sshll.u32 %s2410_s2, 4  ;;  %s2007_s8 = int_to_ptr.vmem [resolvable:$true] %s2006_s8 }
 0x246   :  { %v1854_v47 = vpop.f32.mrf.mxu2  ;;  %v1572_v29 = vsel %vm1569_vm7, %v1571_v4, %v1567_v35  ;;  %v1683_v59 = vadd.f32 %v2358_v17, %v1682_v19  ;;  %v554_v44 = vsub.f32 0.0, %v485_v30  ;;  %v1607_v4 = vmul.f32 %v3485_v25, %v1606_v50 }
 0x247   :  { %v1855_v6 = vadd.f32 %v3437_v54, %v1854_v47  ;;  %v2364_v15 = vpop.eup %2363  ;;  %v677_v41 = vmul.f32 1.442695, %v553_v20  ;;  %v1593_v47 = vadd.f32 %v3444_v38, %v1592_v2  ;;  %vm1610_vm7 = vweird.f32 %v3485_v25 }
 0x248   :  { %v2366_v34 = vpop.eup %2365  ;;  %v1687_v21 = vsel %vm1686_vm11, %v2358_v17, %v1683_v59  ;;  %v1695_v40 = vmul.f32 %v2364_v15, %v3459_v5  ;;  %vm1700_vm2 = vweird.f32 %v2364_v15  ;;  %v679_v46 = vmul.f32 1.442695, %v554_v44  ;;  %vm1611_vm8 = vmor %vm1609_vm6, %vm1610_vm7 }
 0x249   :  { %1974 = vst [vmem:[#allocation2 + $0x120] sm:$0xff] %v1855_v6  ;;  %v1692_v62 = vsel %vm1689_vm12, %v1691_v33, %v1687_v21  ;;  %v3501_v43 = vadd.f32 1.0, %v2366_v34  ;;  %2369 = vpow2.f32 %v677_v41  ;;  %v1705_v6 = vand.u32 2147483648, %v3459_v5  ;;  %v3511_v14 = vpop.eup %2367  ;;  %vm1701_vm3 = vmor %vm1699_vm1, %vm1700_vm2 }
 0x24a   :  { %1931 = vmatmul.f32.vlgmr.msrb.gmra.mxu3 %v1692_v62  ;;  %v1696_v48 = vsub.f32 1.0, %v1695_v40  ;;  %v1597_v1 = vsel %vm3506_vm15, %v3444_v38, %v1593_v47  ;;  %v1620_v17 = vmul.f32 %v3511_v14, %v3478_v60  ;;  %v1608_v35 = vadd.f32 %v3485_v25, %v1607_v4 }
 0x24b   :  { %1904 = vmatmul.f32.gmra.mxu2 %v1557_v56  ;;  %2371 = vrcp.f32 %v3501_v43  ;;  %v1601_v56 = vor.u32 1.1754944e-38, %v1600_v32  ;;  %v1706_v58 = vor.u32 1.1754944e-38, %v1705_v6  ;;  %vm1614_vm9 = vcmp.eq.f32.partialorder %v1613_v18, 8.507059e+37 }
 0x24c   :  { %v1697_v49 = vmul.f32 %v2364_v15, %v1696_v48  ;;  %2373 = vpow2.f32 %v679_v46  ;;  %v1621_v9 = vsub.f32 1.0, %v1620_v17  ;;  %v1612_v20 = vsel %vm1611_vm8, %v3485_v25, %v1608_v35 }
 0x24d   :  { %v1602_v5 = vsel %vm1599_vm4, %v1601_v56, %v1597_v1  ;;  %vm1625_vm11 = vweird.f32 %v3511_v14  ;;  %v1630_v19 = vand.u32 2147483648, %v3478_v60  ;;  %v1628_v24 = vand.u32 2147483647, %v3478_v60 }
 0x24e   :  { %v1857_v7 = vpop.f32.mrf.mxu2  ;;  %v1698_v13 = vadd.f32 %v2364_v15, %v1697_v49  ;;  %v1622_v37 = vmul.f32 %v3511_v14, %v1621_v9  ;;  %vm1626_vm12 = vmor %vm1624_vm10, %vm1625_vm11  ;;  %vm1639_vm0 = vweird.f32 %v3501_v43  ;;  %v1645_v2 = vand.u32 2147483648, %v3501_v43 }
 0x24f   :  { %v1858_v52 = vadd.f32 %v3437_v54, %v1857_v7  ;;  %v2370_v42 = vpop.eup %2369  ;;  %v1631_v59 = vor.u32 1.1754944e-38, %v1630_v19  ;;  %vm1629_vm13 = vcmp.eq.f32.partialorder %v1628_v24, 8.507059e+37  ;;  %v1643_v33 = vand.u32 2147483647, %v3501_v43 }
 0x250   :  { %v1702_v55 = vsel %vm1701_vm3, %v2364_v15, %v1698_v13  ;;  %v3525_v38 = vadd.f32 1.0, %v2370_v42  ;;  %v1623_v23 = vadd.f32 %v3511_v14, %v1622_v37 }
 0x251   :  { %1975 = vst [vmem:[#allocation2 + $0x128] sm:$0xff] %v1858_v52  ;;  %v1707_v27 = vsel %vm1704_vm5, %v1706_v58, %v1702_v55  ;;  %v2372_v7 = vpop.eup %2371  ;;  %vm1644_vm1 = vcmp.eq.f32.partialorder %v1643_v33, 8.507059e+37 }
 0x252   :  { %1934 = vmatmul.f32.gmra.mxu3 %v1707_v27  ;;  %2375 = vrcp.f32 %v3525_v38  ;;  %v1635_v10 = vmul.f32 %v2372_v7, %v3501_v43  ;;  %v2374_v0 = vpop.eup %2373  ;;  %v1627_v41 = vsel %vm1626_vm12, %v3511_v14, %v1623_v23  ;;  %vm1640_vm14 = vweird.f32 %v2372_v7 }
 0x253   :  { %1907 = vmatmul.f32.gmra.mxu2 %v1572_v29  ;;  %v3537_v12 = vadd.f32 1.0, %v2374_v0  ;;  %v1617_v29 = vsel %vm1614_vm9, %v1616_v28, %v1612_v20  ;;  %v1632_v30 = vsel %vm1629_vm13, %v1631_v59, %v1627_v41  ;;  %vm1641_vm15 = vmor %vm1639_vm0, %vm1640_vm14  ;;  %vm1654_vm2 = vweird.f32 %v3525_v38 }
 0x254   :  { %v1636_v39 = vsub.f32 1.0, %v1635_v10  ;;  %v1660_v32 = vand.u32 2147483648, %v3525_v38 }
 0x255   :  { %2377 = vrcp.f32 %v3537_v12  ;;  %vm1669_vm6 = vweird.f32 %v3537_v12  ;;  %v1675_v13 = vand.u32 2147483648, %v3537_v12  ;;  %v1673_v46 = vand.u32 2147483647, %v3537_v12 }
 0x256   :  { %v1860_v16 = vpop.f32.mrf.mxu2  ;;  %v1637_v26 = vmul.f32 %v2372_v7, %v1636_v39  ;;  %v1661_v49 = vor.u32 1.1754944e-38, %v1660_v32 }
 0x257   :  { %v1861_v53 = vadd.f32 %v3437_v54, %v1860_v16  ;;  %v1676_v58 = vor.u32 1.1754944e-38, %v1675_v13  ;;  %vm1674_vm9 = vcmp.eq.f32.partialorder %v1673_v46, 8.507059e+37 }
 0x258   :  { %v2376_v31 = vpop.eup %2375  ;;  %v1638_v60 = vadd.f32 %v2372_v7, %v1637_v26 }
 0x259   :  { %1976 = vst [vmem:[#allocation2 + $0x130] sm:$0xff] %v1861_v53  ;;  %v1650_v57 = vmul.f32 %v2376_v31, %v3525_v38  ;;  %v1646_v53 = vor.u32 1.1754944e-38, %v1645_v2  ;;  %vm1655_vm3 = vweird.f32 %v2376_v31 }
 0x25a   :  { %v1642_v40 = vsel %vm1641_vm15, %v2372_v7, %v1638_v60  ;;  %vm1656_vm4 = vmor %vm1654_vm2, %vm1655_vm3 }
 0x25b   :  { %1910 = vmatmul.f32.gmra.mxu2 %v1587_v45  ;;  %v1651_v34 = vsub.f32 1.0, %v1650_v57  ;;  %v2378_v16 = vpop.eup %2377  ;;  %v1647_v44 = vsel %vm1644_vm1, %v1646_v53, %v1642_v40  ;;  %v1658_v45 = vand.u32 2147483647, %v3525_v38 }
 0x25c   :  { %v1665_v48 = vmul.f32 %v2378_v16, %v3537_v12  ;;  %vm1670_vm7 = vweird.f32 %v2378_v16 }
 0x25d   :  { %v1652_v62 = vmul.f32 %v2376_v31, %v1651_v34  ;;  %vm1659_vm5 = vcmp.eq.f32.partialorder %v1658_v45, 8.507059e+37  ;;  %vm1671_vm8 = vmor %vm1669_vm6, %vm1670_vm7 }
 0x25e   :  { %v1863_v63 = vpop.f32.mrf.mxu2  ;;  %v1666_v47 = vsub.f32 1.0, %v1665_v48 }
 0x25f   :  { %v1864_v3 = vadd.f32 %v3437_v54, %v1863_v63  ;;  %v1653_v43 = vadd.f32 %v2376_v31, %v1652_v62 }
 0x260   :  { %v1667_v6 = vmul.f32 %v2378_v16, %v1666_v47 }
 0x261   :  { %1977 = vst [vmem:[#allocation2 + $0x138] sm:$0xff] %v1864_v3  ;;  %v1657_v50 = vsel %vm1656_vm4, %v2376_v31, %v1653_v43 }
 0x262   :  { %v1662_v14 = vsel %vm1659_vm5, %v1661_v49, %v1657_v50  ;;  %v1668_v51 = vadd.f32 %v2378_v16, %v1667_v6 }
 0x263   :  { %1913 = vmatmul.f32.gmra.mxu2 %v1602_v5 }
 0x264   :  { %v1672_v1 = vsel %vm1671_vm8, %v2378_v16, %v1668_v51 }
 0x265   :  { %v1677_v55 = vsel %vm1674_vm9, %v1676_v58, %v1672_v1 }
 0x266   :  { %v1866_v52 = vpop.f32.mrf.mxu2 }
 0x267   :  { %v1867_v11 = vadd.f32 %v3437_v54, %v1866_v52 }
 0x269   :  { %1978 = vst [vmem:[#allocation2 + $0x140] sm:$0xff] %v1867_v11 }
 0x26b   :  { %1916 = vmatmul.f32.gmra.mxu2 %v1617_v29 }
 0x26e   :  { %v1869_v25 = vpop.f32.mrf.mxu2 }
 0x26f   :  { %v1870_v15 = vadd.f32 %v3437_v54, %v1869_v25 }
 0x271   :  { %1979 = vst [vmem:[#allocation2 + $0x148] sm:$0xff] %v1870_v15 }
 0x273   :  { %1919 = vmatmul.f32.gmra.mxu2 %v1632_v30 }
 0x276   :  { %v1872_v21 = vpop.f32.mrf.mxu2 }
 0x277   :  { %v1873_v61 = vadd.f32 %v3437_v54, %v1872_v21 }
 0x279   :  { %1980 = vst [vmem:[#allocation2 + $0x150] sm:$0xff] %v1873_v61 }
 0x27b   :  { %1922 = vmatmul.f32.gmra.mxu2 %v1647_v44 }
 0x27e   :  { %v1875_v22 = vpop.f32.mrf.mxu2 }
 0x27f   :  { %v1876_v8 = vadd.f32 %v3437_v54, %v1875_v22 }
 0x281   :  { %1981 = vst [vmem:[#allocation2 + $0x158] sm:$0xff] %v1876_v8 }
 0x283   :  { %1925 = vmatmul.f32.gmra.mxu2 %v1662_v14 }
 0x286   :  { %v1878_v56 = vpop.f32.mrf.mxu2 }
 0x287   :  { %v1879_v63 = vadd.f32 %v3437_v54, %v1878_v56 }
 0x289   :  { %1982 = vst [vmem:[#allocation2 + $0x160] sm:$0xff] %v1879_v63 }
 0x28b   :  { %1928 = vmatmul.f32.gmra.mxu2 %v1677_v55 }
 0x28e   :  { %v1881_v42 = vpop.f32.mrf.mxu2 }
 0x28f   :  { %v1882_v3 = vadd.f32 %v3437_v54, %v1881_v42 }
 0x291   :  { %1983 = vst [vmem:[#allocation2 + $0x168] sm:$0xff] %v1882_v3 }
 0x296   :  { %v1884_v4 = vpop.f32.mrf.mxu2 }
 0x297   :  { %v1885_v17 = vadd.f32 %v3437_v54, %v1884_v4 }
 0x299   :  { %1984 = vst [vmem:[#allocation2 + $0x170] sm:$0xff] %v1885_v17 }
 0x29e   :  { %v1887_v27 = vpop.f32.mrf.mxu2 }
 0x29f   :  { %v1888_v38 = vadd.f32 %v3437_v54, %v1887_v27 }
 0x2a1   :  { %1985 = vst [vmem:[#allocation2 + $0x178] sm:$0xff] %v1888_v38 }
 0x2a6   :  { %v1890_v5 = vpop.f32.mrf.mxu2 }
 0x2a7   :  { %v1891_v36 = vadd.f32 %v3437_v54, %v1890_v5 }
 0x2a9   :  { %1986 = vst [vmem:[#allocation2 + $0x180] sm:$0xff] %v1891_v36 }
 0x2ae   :  { %v1893_v7 = vpop.f32.mrf.mxu2 }
 0x2af   :  { %v1894_v35 = vadd.f32 %v3437_v54, %v1893_v7 }
 0x2b1   :  { %1987 = vst [vmem:[#allocation2 + $0x188] sm:$0xff] %v1894_v35 }
 0x2b6   :  { %v1896_v18 = vpop.f32.mrf.mxu2 }
 0x2b7   :  { %v1897_v9 = vadd.f32 %v3437_v54, %v1896_v18 }
 0x2b9   :  { %1988 = vst [vmem:[#allocation2 + $0x190] sm:$0xff] %v1897_v9 }
 0x2be   :  { %v1899_v52 = vpop.f32.mrf.mxu2 }
 0x2bf   :  { %v1900_v28 = vadd.f32 %v3437_v54, %v1899_v52 }
 0x2c1   :  { %1989 = vst [vmem:[#allocation2 + $0x198] sm:$0xff] %v1900_v28 }
 0x2c6   :  { %v1902_v10 = vpop.f32.mrf.mxu2 }
 0x2c7   :  { %v1903_v0 = vadd.f32 %v3437_v54, %v1902_v10 }
 0x2c9   :  { %1990 = vst [vmem:[#allocation2 + $0x1a0] sm:$0xff] %v1903_v0 }
 0x2cd   :  { %v1932_v29 = vpop.f32.mrf.mxu3 }
 0x2ce   :  { %v1905_v11 = vpop.f32.mrf.mxu2  ;;  %v1933_v19 = vadd.f32 %v3437_v54, %v1932_v29 }
 0x2cf   :  { %v1906_v20 = vadd.f32 %v3437_v54, %v1905_v11 }
 0x2d0   :  { %2000 = vst [vmem:[#allocation2 + $0x1f0] sm:$0xff] %v1933_v19 }
 0x2d1   :  { %1991 = vst [vmem:[#allocation2 + $0x1a8] sm:$0xff] %v1906_v20 }
 0x2d5   :  { %v1935_v24 = vpop.f32.mrf.mxu3 }
 0x2d6   :  { %v1908_v37 = vpop.f32.mrf.mxu2  ;;  %v1936_v31 = vadd.f32 %v3437_v54, %v1935_v24 }
 0x2d7   :  { %v1909_v12 = vadd.f32 %v3437_v54, %v1908_v37 }
 0x2d8   :  { %2001 = vst [vmem:[#allocation2 + $0x1f8] sm:$0xff] %v1936_v31 }
 0x2d9   :  { %1992 = vst [vmem:[#allocation2 + $0x1b0] sm:$0xff] %v1909_v12 }
 0x2de   :  { %v1911_v39 = vpop.f32.mrf.mxu2 }
 0x2df   :  { %v1912_v23 = vadd.f32 %v3437_v54, %v1911_v39 }
 0x2e1   :  { %1993 = vst [vmem:[#allocation2 + $0x1b8] sm:$0xff] %v1912_v23 }
 0x2e6   :  { %v1914_v25 = vpop.f32.mrf.mxu2 }
 0x2e7   :  { %v1915_v59 = vadd.f32 %v3437_v54, %v1914_v25 }
 0x2e9   :  { %1994 = vst [vmem:[#allocation2 + $0x1c0] sm:$0xff] %v1915_v59 }
 0x2ee   :  { %v1917_v26 = vpop.f32.mrf.mxu2 }
 0x2ef   :  { %v1918_v15 = vadd.f32 %v3437_v54, %v1917_v26 }
 0x2f1   :  { %1995 = vst [vmem:[#allocation2 + $0x1c8] sm:$0xff] %v1918_v15 }
 0x2f6   :  { %v1920_v41 = vpop.f32.mrf.mxu2 }
 0x2f7   :  { %v1921_v57 = vadd.f32 %v3437_v54, %v1920_v41 }
 0x2f9   :  { %1996 = vst [vmem:[#allocation2 + $0x1d0] sm:$0xff] %v1921_v57 }
 0x2fe   :  { %v1923_v30 = vpop.f32.mrf.mxu2 }
 0x2ff   :  { %v1924_v60 = vadd.f32 %v3437_v54, %v1923_v30 }
 0x301   :  { %1997 = vst [vmem:[#allocation2 + $0x1d8] sm:$0xff] %v1924_v60 }
 0x306   :  { %v1926_v2 = vpop.f32.mrf.mxu2 }
 0x307   :  { %v1927_v33 = vadd.f32 %v3437_v54, %v1926_v2 }
 0x309   :  { %1998 = vst [vmem:[#allocation2 + $0x1e0] sm:$0xff] %v1927_v33 }
 0x30e   :  { %v1929_v34 = vpop.f32.mrf.mxu2 }
 0x30f   :  { %v1930_v16 = vadd.f32 %v3437_v54, %v1929_v34 }
 0x311   :  { %1999 = vst [vmem:[#allocation2 + $0x1e8] sm:$0xff] %v1930_v16 }
 0x312   :  { %2014 = dma.vmem_to_hbm [thread:$0]  %s2007_s8, 8192, %s2009_s11, [#allocation3], %s2411_s12, %s2411_s12, %s2412_s13  }
 0x313   :  { %2408 = dma.done.wait [#allocation3], 8192  }
 0x314   :  { %2409 = vsyncadd [#allocation3], 4294959104 }
 0x315   :  { %2019 = vsyncpa [#allocation3], 1 }

</bundles_post_ra>
